<compile_context>
chip_gen: v5e
topology: v5e:2x2
jax: 0.10.0
libtpu: 0.0.40
codegen_flags: <defaults>
</compile_context>

<pallas_src>
import math

import jax
import jax.numpy as jnp
from jax import lax
from jax.experimental import pallas as pl
from jax.experimental.pallas import tpu as pltpu

CPAD = 8  # coordinate lane padding (3 -> 8) for aligned coordinate matmuls


def _silu(x):
    # x * sigmoid(x) == 0.5 * x * (1 + tanh(x / 2)): one EUP op per element.
    return 0.5 * x * (1.0 + jnp.tanh(0.5 * x))


def _round_up(x, m):
    return ((x + m - 1) // m) * m


def _hw_tile_defaults():
    """(block_i, block_j, vmem_limit_bytes) sized to this chip's VMEM."""
    try:
        vmem_cap = pltpu.get_tpu_info().vmem_capacity_bytes
    except Exception:
        vmem_cap = 64 * 1024 * 1024
    if vmem_cap >= 96 * 1024 * 1024:          # v5e / v6e: 128 MiB VMEM
        return 128, 128, 96 * 1024 * 1024
    return 64, 64, 40 * 1024 * 1024           # v7x: 64 MiB VMEM


def _pick_tiling(n, block_i, block_j, def_bi, def_bj):
    """Choose (n_pad, block_i, block_j)."""
    if block_i is None and block_j is None:
        n8 = _round_up(n, 8)
        if n8 <= 64:
            return n8, n8, n8
        n_pad = _round_up(n, math.lcm(def_bi, def_bj))
        return n_pad, def_bi, def_bj
    bi = block_i if block_i is not None else def_bi
    bj = block_j if block_j is not None else def_bj
    assert bi % 8 == 0 and bj % 8 == 0, "pair blocks must be multiples of 8"
    n_pad = _round_up(n, math.lcm(bi, bj))
    return n_pad, bi, bj


def _egnn_kernel(coors_i_ref, coors_j_ref, feats_i_ref, feats_j_ref,
                 mask_i_ref, mask_j_ref,
                 ew1a_ref, ew1b_ref, ew2_ref, cw1_ref,
                 nw1f_ref, nw1m_ref, nw2_ref, misc_ref,
                 coors_out_ref, feats_out_ref,
                 acc_coor_ref, acc_m_ref, fa_ref):
    j_step = pl.program_id(2)
    n_j = pl.num_programs(2)

    coors_i = coors_i_ref[0]          # (bi, CPAD)  f32 (lanes 3..7 are zero)
    coors_j = coors_j_ref[0]          # (bj, CPAD)
    feats_i = feats_i_ref[0]          # (bi, D)
    feats_j = feats_j_ref[0]          # (bj, D)
    mask_j = mask_j_ref[0]            # (bj, 1)

    bi = feats_i.shape[0]
    bj = feats_j.shape[0]
    d = feats_i.shape[1]
    m_dim = ew2_ref.shape[1]
    h2 = cw1_ref.shape[1]
    h3 = nw2_ref.shape[0]

    # packed small row vectors, one (8, H1P) f32 tile
    misc = misc_ref[...]
    ew1c = misc[0:1, :]               # (1, H1P) rel_dist column of edge layer 1
    eb1 = misc[1:2, :]                # (1, H1P)
    eb2 = misc[2:3, :m_dim]           # (1, M)
    cb1 = misc[3:4, :h2]              # (1, H2)
    cw2 = misc[4:5, :h2]              # (1, H2)
    cb2 = misc[5:6, 0:1]              # (1, 1)
    nb1 = misc[6:7, :h3]              # (1, H3)
    nb2 = misc[7:8, :d]               # (1, D)

    @pl.when(j_step == 0)
    def _():
        acc_coor_ref[...] = jnp.zeros_like(acc_coor_ref)
        acc_m_ref[...] = jnp.zeros_like(acc_m_ref)
        # i-side first edge-MLP layer, invariant across the j reduction:
        # fa' = feats_i @ ew1a + eb1 + ||x_i||^2 * ew1c   (bi, H1P)
        sq_i = jnp.sum(coors_i * coors_i, axis=-1, keepdims=True)      # (bi, 1)
        fa_ref[...] = (jnp.dot(feats_i.astype(jnp.bfloat16), ew1a_ref[...],
                               preferred_element_type=jnp.float32)
                       + eb1 + sq_i * ew1c)

    fa2 = fa_ref[...]                                                   # (bi, H1P)

    # j-side per-node piece (+ ||x_j||^2 folded onto the rel_dist column)
    sq_j = jnp.sum(coors_j * coors_j, axis=-1, keepdims=True)           # (bj, 1)
    fb2 = (jnp.dot(feats_j.astype(jnp.bfloat16), ew1b_ref[...],
                   preferred_element_type=jnp.float32)
           + sq_j * ew1c)                                               # (bj, H1P)

    # -2 x_i . x_j via one small MXU matmul (expanded-square distance); this
    # replaces the old (bi, bj, 3) rel tensor entirely.
    cross = lax.dot_general(coors_i, coors_j, (((1,), (1,)), ((), ())),
                            preferred_element_type=jnp.float32)         # (bi, bj)
    pair_b = (-2.0 * cross)[:, :, None]                                 # (bi, bj, 1)

    # Edge MLP on the pair tile (pair-major layout, hidden on lanes).
    h = _silu(fa2[:, None, :] + fb2[None, :, :] + pair_b * ew1c[None, :, :])
    h_flat = h.reshape(bi * bj, -1)                                     # (P, H1P)
    m_flat = _silu(jnp.dot(h_flat.astype(jnp.bfloat16), ew2_ref[...],
                           preferred_element_type=jnp.float32) + eb2)   # (P, M)
    ch = _silu(jnp.dot(m_flat.astype(jnp.bfloat16), cw1_ref[...],
                       preferred_element_type=jnp.float32) + cb1)       # (P, H2)

    # Coordinate weights: lane reduce over H2, pair-major -> (bi, bj).
    w_pair = jnp.sum(ch.reshape(bi, bj, h2) * cw2[None, :, :],
                     axis=-1) + cb2                                     # (bi, bj)

    # sum_j w_ij m_j (x_i - x_j) = (W @ m_col) * x_i - W @ (m_col * x_j):
    # mask_j is folded into the RHS, so W itself stays unmasked.
    cjm = coors_j * mask_j                                              # (bj, CPAD)
    wx = jnp.dot(w_pair, cjm, preferred_element_type=jnp.float32)       # (bi, CPAD)
    rs = jnp.dot(w_pair, mask_j, preferred_element_type=jnp.float32)    # (bi, 1)
    acc_coor_ref[...] += rs * coors_i - wx

    # Message j-reduction (mask_j folded with a single multiply on the sparse
    # (bi, bj, M) layout; moderate cost, kept simple per review item 8).
    m3 = m_flat.reshape(bi, bj, m_dim) * mask_j[None, :, :]
    acc_m_ref[...] += jnp.sum(m3, axis=1)                               # (bi, M)

    @pl.when(j_step == n_j - 1)
    def _():
        mask_i = mask_i_ref[0]                                          # (bi, 1)
        coors_out_ref[0] = (coors_i + acc_coor_ref[...] * mask_i
                            ).astype(coors_out_ref.dtype)
        m_i = acc_m_ref[...] * mask_i                                   # (bi, M)
        # Node MLP kept f32: runs once per (b, i) tile, negligible MXU cost.
        nh = _silu(jnp.dot(feats_i, nw1f_ref[...],
                           preferred_element_type=jnp.float32)
                   + jnp.dot(m_i, nw1m_ref[...],
                             preferred_element_type=jnp.float32)
                   + nb1)
        feats_out_ref[0] = (jnp.dot(nh, nw2_ref[...],
                                    preferred_element_type=jnp.float32)
                            + nb2 + feats_i).astype(feats_out_ref.dtype)


def init_params(key, dim=32, m_dim=16):
    """Deterministic synthetic parameters with EGNN __init__ shapes."""
    edge_in = 2 * dim + 1          # fourier_features = 0
    h1 = 2 * edge_in               # edge_mlp hidden
    h2 = 4 * m_dim                 # coors_mlp hidden
    h3 = 2 * dim                   # node_mlp hidden
    shapes = dict(
        ew1=(edge_in, h1), eb1=(1, h1),
        ew2=(h1, m_dim), eb2=(1, m_dim),
        cw1=(m_dim, h2), cb1=(1, h2),
        cw2=(h2, 1), cb2=(1, 1),
        nw1=(dim + m_dim, h3), nb1=(1, h3),
        nw2=(h3, dim), nb2=(1, dim),
    )
    params = {}
    keys = jax.random.split(key, len(shapes))
    for k_, (name, shp) in zip(keys, sorted(shapes.items())):
        fan_in = shp[0]
        params[name] = (jax.random.normal(k_, shp, jnp.float32)
                        / jnp.sqrt(jnp.float32(fan_in)))
    return params


def egnn_pass_pallas(x, params, block_i=None, block_j=None):
    """Mirrors EGNNPass.forward: x is (coors, feats) or (coors, feats, mask)."""
    if len(x) == 2:
        coors, feats = x
        mask = None
    else:
        coors, feats, mask = x
    b, n, d = feats.shape

    def_bi, def_bj, vmem_limit = _hw_tile_defaults()
    n_pad, bi, bj = _pick_tiling(n, block_i, block_j, def_bi, def_bj)
    pad = n_pad - n

    coors_p = jnp.pad(coors.astype(jnp.float32),
                      ((0, 0), (0, pad), (0, CPAD - coors.shape[-1])))
    feats_p = jnp.pad(feats.astype(jnp.float32), ((0, 0), (0, pad), (0, 0)))
    if mask is None:
        mask_f = jnp.ones((b, n), jnp.float32)
    else:
        mask_f = mask.astype(jnp.float32)
    mask_p = jnp.pad(mask_f, ((0, 0), (0, pad)))[..., None]   # (B, n_pad, 1)

    # --- weight prep (all wrapper-side, outside the kernel) ----------------
    dim = d
    ew1 = params['ew1']
    h1 = ew1.shape[1]
    h1p = _round_up(h1, 128)                 # 130 -> 256 lane-aligned
    pad_h1 = h1p - h1

    # Pair-path weights in bf16 (MXU); f32 accumulation in-kernel.
    ew1a = jnp.pad(ew1[:dim], ((0, 0), (0, pad_h1))).astype(jnp.bfloat16)
    ew1b = jnp.pad(ew1[dim:2 * dim], ((0, 0), (0, pad_h1))).astype(jnp.bfloat16)
    ew1c_row = jnp.pad(ew1[2 * dim:2 * dim + 1], ((0, 0), (0, pad_h1)))
    eb1 = jnp.pad(params['eb1'], ((0, 0), (0, pad_h1)))
    ew2 = jnp.pad(params['ew2'], ((0, pad_h1), (0, 0))).astype(jnp.bfloat16)
    cw1 = params['cw1'].astype(jnp.bfloat16)

    cw2_row = params['cw2'].T                                   # (1, h2)
    nw1 = params['nw1']
    nw1f, nw1m = nw1[:dim], nw1[dim:]                           # f32 (finalize only)
    nw2 = params['nw2']                                         # f32
    m_dim = ew2.shape[1]

    def _row(v):
        return jnp.pad(v, ((0, 0), (0, h1p - v.shape[1])))

    misc = jnp.concatenate([
        _row(ew1c_row), _row(eb1),
        _row(params['eb2']), _row(params['cb1']), _row(cw2_row),
        _row(params['cb2']), _row(params['nb1']), _row(params['nb2']),
    ], axis=0)                                                  # (8, h1p) f32

    weights = [ew1a, ew1b, ew2, cw1, nw1f, nw1m, nw2, misc]

    # --- grid / specs -------------------------------------------------------
    i_map = lambda b_, i_, j_: (b_, i_, 0)
    j_map = lambda b_, i_, j_: (b_, j_, 0)
    w_map = lambda b_, i_, j_: (0, 0)

    in_specs = ([pl.BlockSpec((1, bi, CPAD), i_map),
                 pl.BlockSpec((1, bj, CPAD), j_map),
                 pl.BlockSpec((1, bi, d), i_map),
                 pl.BlockSpec((1, bj, d), j_map),
                 pl.BlockSpec((1, bi, 1), i_map),
                 pl.BlockSpec((1, bj, 1), j_map)]
                + [pl.BlockSpec(w.shape, w_map) for w in weights])

    out_specs = (pl.BlockSpec((1, bi, CPAD), i_map),
                 pl.BlockSpec((1, bi, d), i_map))
    out_shape = (jax.ShapeDtypeStruct((b, n_pad, CPAD), coors.dtype),
                 jax.ShapeDtypeStruct((b, n_pad, d), feats.dtype))

    grid = (b, n_pad // bi, n_pad // bj)

    coors_out, feats_out = pl.pallas_call(
        _egnn_kernel,
        grid=grid,
        in_specs=in_specs,
        out_specs=out_specs,
        out_shape=out_shape,
        scratch_shapes=[pltpu.VMEM((bi, CPAD), jnp.float32),   # acc_coor
                        pltpu.VMEM((bi, m_dim), jnp.float32),  # acc_m
                        pltpu.VMEM((bi, h1p), jnp.float32)],   # hoisted fa
        compiler_params=pltpu.CompilerParams(
            dimension_semantics=("parallel", "parallel", "arbitrary"),
            vmem_limit_bytes=vmem_limit),
    )(coors_p, coors_p, feats_p, feats_p, mask_p, mask_p, *weights)

    # drop padded nodes / padded coord lanes; same return as EGNNPass.forward
    return coors_out[:, :n, :3], feats_out[:, :n], mask


def egnn_ref(coors, feats, mask, params):
    """Pure-JAX f32 reference of the same EGNN layer."""
    def silu(x):
        return x * jax.nn.sigmoid(x)
    b, n, d = feats.shape
    rel = coors[:, :, None, :] - coors[:, None, :, :]
    rel_dist = jnp.sum(rel ** 2, axis=-1, keepdims=True)
    fi = jnp.broadcast_to(feats[:, :, None, :], (b, n, n, d))
    fj = jnp.broadcast_to(feats[:, None, :, :], (b, n, n, d))
    edge_in = jnp.concatenate([fi, fj, rel_dist], axis=-1)
    h = silu(edge_in @ params['ew1'] + params['eb1'])
    m_ij = silu(h @ params['ew2'] + params['eb2'])
    ch = silu(m_ij @ params['cw1'] + params['cb1'])
    coor_w = (ch @ params['cw2'] + params['cb2'])[..., 0]
    if mask is not None:
        m2 = (mask.astype(jnp.float32)[:, :, None]
              * mask.astype(jnp.float32)[:, None, :])
    else:
        m2 = jnp.ones((b, n, n), jnp.float32)
    coor_w = coor_w * m2
    m_ij = m_ij * m2[..., None]
    coors_out = jnp.einsum('bij,bijc->bic', coor_w, rel) + coors
    m_i = jnp.sum(m_ij, axis=2)
    node_in = jnp.concatenate([feats, m_i], axis=-1)
    nh = silu(node_in @ params['nw1'] + params['nb1'])
    feats_out = nh @ params['nw2'] + params['nb2'] + feats
    return coors_out, feats_out


def _rel_err(a, b):
    return float(jnp.linalg.norm(a - b) / (jnp.linalg.norm(b) + 1e-12))


if __name__ == "__main__":
    key = jax.random.PRNGKey(0)
    kc, kf, km, kp = jax.random.split(key, 4)
    B, N, D, M = 2, 20, 32, 16

    coors = jax.random.normal(kc, (B, N, 3), jnp.float32)
    feats = jax.random.normal(kf, (B, N, D), jnp.float32)
    mask = jax.random.uniform(km, (B, N)) > 0.2
    params = init_params(kp, dim=D, m_dim=M)

    # Masked path; explicit small pair tiles (8x8) so the (B, i, j) grid, the
    # j-axis accumulators and node padding are exercised:
    # N=20 -> n_pad=24, grid = (2, 3, 3).
    coors_out, feats_out, mask_out = egnn_pass_pallas(
        (coors, feats, mask), params, block_i=8, block_j=8)
    jax.block_until_ready((coors_out, feats_out))

    c_ref, f_ref = egnn_ref(coors, feats, mask, params)
    assert coors_out.shape == (B, N, 3) and feats_out.shape == (B, N, D)
    assert mask_out is mask
    # Loosened tolerances: kernel uses bf16 MXU operands vs an f32 reference.
    assert jnp.allclose(coors_out, c_ref, atol=5e-2, rtol=5e-2)
    assert jnp.allclose(feats_out, f_ref, atol=5e-2, rtol=5e-2)
    assert _rel_err(coors_out, c_ref) < 3e-2
    assert _rel_err(feats_out, f_ref) < 3e-2

    # 2-tuple (no-mask) branch with the default (small-N) tiling.
    c2, f2 = coors[:, :8], feats[:, :8]
    c2_out, f2_out, m2_out = egnn_pass_pallas((c2, f2), params)
    jax.block_until_ready((c2_out, f2_out))
    c2_ref, f2_ref = egnn_ref(c2, f2, None, params)
    assert m2_out is None
    assert jnp.allclose(c2_out, c2_ref, atol=5e-2, rtol=5e-2)
    assert jnp.allclose(f2_out, f2_ref, atol=5e-2, rtol=5e-2)
    assert _rel_err(c2_out, c2_ref) < 3e-2
    assert _rel_err(f2_out, f2_ref) < 3e-2

    print("KERNEL_OK")
</pallas_src>

<mosaic_0001>
module attributes {stable_mosaic.version = 11 : i64} {
  func.func @_egnn_kernel(%arg0: i32, %arg1: i32, %arg2: i32, %arg3: memref<1x8x8xf32, #tpu.memory_space<vmem>>, %arg4: memref<1x8x8xf32, #tpu.memory_space<vmem>>, %arg5: memref<1x8x32xf32, #tpu.memory_space<vmem>>, %arg6: memref<1x8x32xf32, #tpu.memory_space<vmem>>, %arg7: memref<1x8x1xf32, #tpu.memory_space<vmem>>, %arg8: memref<1x8x1xf32, #tpu.memory_space<vmem>>, %arg9: memref<32x256xbf16, #tpu.memory_space<vmem>>, %arg10: memref<32x256xbf16, #tpu.memory_space<vmem>>, %arg11: memref<256x16xbf16, #tpu.memory_space<vmem>>, %arg12: memref<16x64xbf16, #tpu.memory_space<vmem>>, %arg13: memref<32x64xf32, #tpu.memory_space<vmem>>, %arg14: memref<16x64xf32, #tpu.memory_space<vmem>>, %arg15: memref<64x32xf32, #tpu.memory_space<vmem>>, %arg16: memref<8x256xf32, #tpu.memory_space<vmem>>, %arg17: memref<1x8x8xf32, #tpu.memory_space<vmem>>, %arg18: memref<1x8x32xf32, #tpu.memory_space<vmem>>, %arg19: memref<8x8xf32, #tpu.memory_space<vmem>>, %arg20: memref<8x16xf32, #tpu.memory_space<vmem>>, %arg21: memref<8x256xf32, #tpu.memory_space<vmem>>) attributes {dimension_semantics = [#tpu.dimension_semantics<parallel>, #tpu.dimension_semantics<parallel>, #tpu.dimension_semantics<arbitrary>], iteration_bounds = array<i64: 2, 3, 3>, scalar_prefetch = 0 : i64, scratch_operands = 3 : i64, tpu.core_type = #tpu.core_type<tc>, window_params = [{transform_indices = @transform_0, window_bounds = array<i64: 1, 8, 8>}, {transform_indices = @transform_1, window_bounds = array<i64: 1, 8, 8>}, {transform_indices = @transform_2, window_bounds = array<i64: 1, 8, 32>}, {transform_indices = @transform_3, window_bounds = array<i64: 1, 8, 32>}, {transform_indices = @transform_4, window_bounds = array<i64: 1, 8, 1>}, {transform_indices = @transform_5, window_bounds = array<i64: 1, 8, 1>}, {pipeline_mode = #tpu.pipeline_mode<synchronous>, transform_indices = @transform_6, window_bounds = array<i64: 32, 256>}, {pipeline_mode = #tpu.pipeline_mode<synchronous>, transform_indices = @transform_7, window_bounds = array<i64: 32, 256>}, {pipeline_mode = #tpu.pipeline_mode<synchronous>, transform_indices = @transform_8, window_bounds = array<i64: 256, 16>}, {pipeline_mode = #tpu.pipeline_mode<synchronous>, transform_indices = @transform_9, window_bounds = array<i64: 16, 64>}, {pipeline_mode = #tpu.pipeline_mode<synchronous>, transform_indices = @transform_10, window_bounds = array<i64: 32, 64>}, {pipeline_mode = #tpu.pipeline_mode<synchronous>, transform_indices = @transform_11, window_bounds = array<i64: 16, 64>}, {pipeline_mode = #tpu.pipeline_mode<synchronous>, transform_indices = @transform_12, window_bounds = array<i64: 64, 32>}, {pipeline_mode = #tpu.pipeline_mode<synchronous>, transform_indices = @transform_13, window_bounds = array<i64: 8, 256>}, {transform_indices = @transform_14, window_bounds = array<i64: 1, 8, 8>}, {transform_indices = @transform_15, window_bounds = array<i64: 1, 8, 32>}]} {
    %c0 = arith.constant 0 : index
    %c0_0 = arith.constant 0 : index
    %c0_1 = arith.constant 0 : index
    %0 = vector.load %arg3[%c0, %c0_0, %c0_1] : memref<1x8x8xf32, #tpu.memory_space<vmem>>, vector<1x8x8xf32>
    %1 = vector.shape_cast %0 : vector<1x8x8xf32> to vector<8x8xf32>
    %c0_2 = arith.constant 0 : index
    %c0_3 = arith.constant 0 : index
    %c0_4 = arith.constant 0 : index
    %2 = vector.load %arg4[%c0_2, %c0_3, %c0_4] : memref<1x8x8xf32, #tpu.memory_space<vmem>>, vector<1x8x8xf32>
    %3 = vector.shape_cast %2 : vector<1x8x8xf32> to vector<8x8xf32>
    %c0_5 = arith.constant 0 : index
    %c0_6 = arith.constant 0 : index
    %c0_7 = arith.constant 0 : index
    %4 = vector.load %arg5[%c0_5, %c0_6, %c0_7] : memref<1x8x32xf32, #tpu.memory_space<vmem>>, vector<1x8x32xf32>
    %5 = vector.shape_cast %4 : vector<1x8x32xf32> to vector<8x32xf32>
    %c0_8 = arith.constant 0 : index
    %c0_9 = arith.constant 0 : index
    %c0_10 = arith.constant 0 : index
    %6 = vector.load %arg6[%c0_8, %c0_9, %c0_10] : memref<1x8x32xf32, #tpu.memory_space<vmem>>, vector<1x8x32xf32>
    %7 = vector.shape_cast %6 : vector<1x8x32xf32> to vector<8x32xf32>
    %c0_11 = arith.constant 0 : index
    %c0_12 = arith.constant 0 : index
    %c0_13 = arith.constant 0 : index
    %8 = vector.load %arg8[%c0_11, %c0_12, %c0_13] : memref<1x8x1xf32, #tpu.memory_space<vmem>>, vector<1x8x1xf32>
    %9 = vector.shape_cast %8 : vector<1x8x1xf32> to vector<8x1xf32>
    %c0_14 = arith.constant 0 : index
    %c0_15 = arith.constant 0 : index
    %10 = vector.load %arg16[%c0_14, %c0_15] : memref<8x256xf32, #tpu.memory_space<vmem>>, vector<8x256xf32>
    %11 = vector.extract_strided_slice %10 {offsets = [0, 0], sizes = [1, 256], strides = [1, 1]} : vector<8x256xf32> to vector<1x256xf32>
    %12 = vector.extract_strided_slice %10 {offsets = [1, 0], sizes = [1, 256], strides = [1, 1]} : vector<8x256xf32> to vector<1x256xf32>
    %13 = vector.extract_strided_slice %10 {offsets = [2, 0], sizes = [1, 16], strides = [1, 1]} : vector<8x256xf32> to vector<1x16xf32>
    %14 = vector.extract_strided_slice %10 {offsets = [3, 0], sizes = [1, 64], strides = [1, 1]} : vector<8x256xf32> to vector<1x64xf32>
    %15 = vector.extract_strided_slice %10 {offsets = [4, 0], sizes = [1, 64], strides = [1, 1]} : vector<8x256xf32> to vector<1x64xf32>
    %16 = vector.extract_strided_slice %10 {offsets = [5, 0], sizes = [1, 1], strides = [1, 1]} : vector<8x256xf32> to vector<1x1xf32>
    %17 = vector.extract_strided_slice %10 {offsets = [6, 0], sizes = [1, 64], strides = [1, 1]} : vector<8x256xf32> to vector<1x64xf32>
    %18 = vector.extract_strided_slice %10 {offsets = [7, 0], sizes = [1, 32], strides = [1, 1]} : vector<8x256xf32> to vector<1x32xf32>
    %c0_i32 = arith.constant 0 : i32
    %19 = arith.cmpi eq, %arg2, %c0_i32 : i32
    %20 = arith.extui %19 : i1 to i32
    %c0_i32_16 = arith.constant 0 : i32
    %21 = arith.cmpi ne, %20, %c0_i32_16 : i32
    scf.if %21 {
      %cst_52 = arith.constant 0.000000e+00 : f32
      %110 = vector.broadcast %cst_52 : f32 to vector<8x8xf32>
      %c0_53 = arith.constant 0 : index
      %c0_54 = arith.constant 0 : index
      %111 = vector.load %arg19[%c0_53, %c0_54] : memref<8x8xf32, #tpu.memory_space<vmem>>, vector<8x8xf32>
      tpu.vector_store %arg19[%c0_53, %c0_54], %110 {strides = array<i32>} : memref<8x8xf32, #tpu.memory_space<vmem>>, vector<8x8xf32>,
      %cst_55 = arith.constant 0.000000e+00 : f32
      %112 = vector.broadcast %cst_55 : f32 to vector<8x16xf32>
      %c0_56 = arith.constant 0 : index
      %c0_57 = arith.constant 0 : index
      %113 = vector.load %arg20[%c0_56, %c0_57] : memref<8x16xf32, #tpu.memory_space<vmem>>, vector<8x16xf32>
      tpu.vector_store %arg20[%c0_56, %c0_57], %112 {strides = array<i32>} : memref<8x16xf32, #tpu.memory_space<vmem>>, vector<8x16xf32>,
      %114 = arith.mulf %1, %1 : vector<8x8xf32>
      %cst_58 = arith.constant dense<0.000000e+00> : vector<8xf32>
      %115 = vector.multi_reduction <add>, %114, %cst_58 [1] : vector<8x8xf32> to vector<8xf32>
      %116 = vector.shape_cast %115 : vector<8xf32> to vector<8x1xf32>
      %117 = arith.truncf %5 : vector<8x32xf32> to vector<8x32xbf16>
      %c0_59 = arith.constant 0 : index
      %c0_60 = arith.constant 0 : index
      %118 = vector.load %arg9[%c0_59, %c0_60] : memref<32x256xbf16, #tpu.memory_space<vmem>>, vector<32x256xbf16>
      %cst_61 = arith.constant dense<0.000000e+00> : vector<8x256xf32>
      %119 = tpu.matmul %117, %118, %cst_61 {dimension_numbers = #tpu.dot_dimension_numbers<[1], [0], [0], [1], [0, 0, 1, 1], [], []>} : vector<8x32xbf16>, vector<32x256xbf16>, vector<8x256xf32> -> vector<8x256xf32>
      %120 = vector.broadcast %12 : vector<1x256xf32> to vector<8x256xf32>
      %121 = arith.addf %119, %120 : vector<8x256xf32>
      %122 = vector.broadcast %116 : vector<8x1xf32> to vector<8x256xf32>
      %123 = vector.broadcast %11 : vector<1x256xf32> to vector<8x256xf32>
      %124 = arith.mulf %122, %123 : vector<8x256xf32>
      %125 = arith.addf %121, %124 : vector<8x256xf32>
      %c0_62 = arith.constant 0 : index
      %c0_63 = arith.constant 0 : index
      %126 = vector.load %arg21[%c0_62, %c0_63] : memref<8x256xf32, #tpu.memory_space<vmem>>, vector<8x256xf32>
      tpu.vector_store %arg21[%c0_62, %c0_63], %125 {strides = array<i32>} : memref<8x256xf32, #tpu.memory_space<vmem>>, vector<8x256xf32>,
    } else {
    }
    %c0_17 = arith.constant 0 : index
    %c0_18 = arith.constant 0 : index
    %22 = vector.load %arg21[%c0_17, %c0_18] : memref<8x256xf32, #tpu.memory_space<vmem>>, vector<8x256xf32>
    %23 = arith.mulf %3, %3 : vector<8x8xf32>
    %cst = arith.constant dense<0.000000e+00> : vector<8xf32>
    %24 = vector.multi_reduction <add>, %23, %cst [1] : vector<8x8xf32> to vector<8xf32>
    %25 = vector.shape_cast %24 : vector<8xf32> to vector<8x1xf32>
    %26 = arith.truncf %7 : vector<8x32xf32> to vector<8x32xbf16>
    %c0_19 = arith.constant 0 : index
    %c0_20 = arith.constant 0 : index
    %27 = vector.load %arg10[%c0_19, %c0_20] : memref<32x256xbf16, #tpu.memory_space<vmem>>, vector<32x256xbf16>
    %cst_21 = arith.constant dense<0.000000e+00> : vector<8x256xf32>
    %28 = tpu.matmul %26, %27, %cst_21 {dimension_numbers = #tpu.dot_dimension_numbers<[1], [0], [0], [1], [0, 0, 1, 1], [], []>} : vector<8x32xbf16>, vector<32x256xbf16>, vector<8x256xf32> -> vector<8x256xf32>
    %29 = vector.broadcast %25 : vector<8x1xf32> to vector<8x256xf32>
    %30 = vector.broadcast %11 : vector<1x256xf32> to vector<8x256xf32>
    %31 = arith.mulf %29, %30 : vector<8x256xf32>
    %32 = arith.addf %28, %31 : vector<8x256xf32>
    %cst_22 = arith.constant dense<0.000000e+00> : vector<8x8xf32>
    %33 = tpu.matmul %1, %3, %cst_22 {dimension_numbers = #tpu.dot_dimension_numbers<[1], [1], [0], [0], [0, 0, 1, 0], [], []>} : vector<8x8xf32>, vector<8x8xf32>, vector<8x8xf32> -> vector<8x8xf32>
    %cst_23 = arith.constant -2.000000e+00 : f32
    %34 = vector.broadcast %cst_23 : f32 to vector<8x8xf32>
    %35 = arith.mulf %34, %33 : vector<8x8xf32>
    %36 = vector.shape_cast %35 : vector<8x8xf32> to vector<8x8x1xf32>
    %37 = vector.shape_cast %22 : vector<8x256xf32> to vector<8x1x256xf32>
    %38 = vector.shape_cast %32 : vector<8x256xf32> to vector<1x8x256xf32>
    %39 = vector.broadcast %37 : vector<8x1x256xf32> to vector<8x8x256xf32>
    %40 = vector.broadcast %38 : vector<1x8x256xf32> to vector<8x8x256xf32>
    %41 = arith.addf %39, %40 : vector<8x8x256xf32>
    %42 = vector.shape_cast %11 : vector<1x256xf32> to vector<1x1x256xf32>
    %43 = vector.broadcast %36 : vector<8x8x1xf32> to vector<8x8x256xf32>
    %44 = vector.broadcast %42 : vector<1x1x256xf32> to vector<8x8x256xf32>
    %45 = arith.mulf %43, %44 : vector<8x8x256xf32>
    %46 = arith.addf %41, %45 : vector<8x8x256xf32>
    %cst_24 = arith.constant 5.000000e-01 : f32
    %47 = vector.broadcast %cst_24 : f32 to vector<8x8x256xf32>
    %48 = arith.mulf %47, %46 : vector<8x8x256xf32>
    %cst_25 = arith.constant 5.000000e-01 : f32
    %49 = vector.broadcast %cst_25 : f32 to vector<8x8x256xf32>
    %50 = arith.mulf %49, %46 : vector<8x8x256xf32>
    %51 = math.tanh %50 : vector<8x8x256xf32>
    %cst_26 = arith.constant 1.000000e+00 : f32
    %52 = vector.broadcast %cst_26 : f32 to vector<8x8x256xf32>
    %53 = arith.addf %52, %51 : vector<8x8x256xf32>
    %54 = arith.mulf %48, %53 : vector<8x8x256xf32>
    %55 = vector.shape_cast %54 : vector<8x8x256xf32> to vector<64x256xf32>
    %56 = arith.truncf %55 : vector<64x256xf32> to vector<64x256xbf16>
    %c0_27 = arith.constant 0 : index
    %c0_28 = arith.constant 0 : index
    %57 = vector.load %arg11[%c0_27, %c0_28] : memref<256x16xbf16, #tpu.memory_space<vmem>>, vector<256x16xbf16>
    %cst_29 = arith.constant dense<0.000000e+00> : vector<64x16xf32>
    %58 = tpu.matmul %56, %57, %cst_29 {dimension_numbers = #tpu.dot_dimension_numbers<[1], [0], [0], [1], [0, 0, 1, 1], [], []>} : vector<64x256xbf16>, vector<256x16xbf16>, vector<64x16xf32> -> vector<64x16xf32>
    %59 = vector.broadcast %13 : vector<1x16xf32> to vector<64x16xf32>
    %60 = arith.addf %58, %59 : vector<64x16xf32>
    %cst_30 = arith.constant 5.000000e-01 : f32
    %61 = vector.broadcast %cst_30 : f32 to vector<64x16xf32>
    %62 = arith.mulf %61, %60 : vector<64x16xf32>
    %cst_31 = arith.constant 5.000000e-01 : f32
    %63 = vector.broadcast %cst_31 : f32 to vector<64x16xf32>
    %64 = arith.mulf %63, %60 : vector<64x16xf32>
    %65 = math.tanh %64 : vector<64x16xf32>
    %cst_32 = arith.constant 1.000000e+00 : f32
    %66 = vector.broadcast %cst_32 : f32 to vector<64x16xf32>
    %67 = arith.addf %66, %65 : vector<64x16xf32>
    %68 = arith.mulf %62, %67 : vector<64x16xf32>
    %69 = arith.truncf %68 : vector<64x16xf32> to vector<64x16xbf16>
    %c0_33 = arith.constant 0 : index
    %c0_34 = arith.constant 0 : index
    %70 = vector.load %arg12[%c0_33, %c0_34] : memref<16x64xbf16, #tpu.memory_space<vmem>>, vector<16x64xbf16>
    %cst_35 = arith.constant dense<0.000000e+00> : vector<64x64xf32>
    %71 = tpu.matmul %69, %70, %cst_35 {dimension_numbers = #tpu.dot_dimension_numbers<[1], [0], [0], [1], [0, 0, 1, 1], [], []>} : vector<64x16xbf16>, vector<16x64xbf16>, vector<64x64xf32> -> vector<64x64xf32>
    %72 = vector.broadcast %14 : vector<1x64xf32> to vector<64x64xf32>
    %73 = arith.addf %71, %72 : vector<64x64xf32>
    %cst_36 = arith.constant 5.000000e-01 : f32
    %74 = vector.broadcast %cst_36 : f32 to vector<64x64xf32>
    %75 = arith.mulf %74, %73 : vector<64x64xf32>
    %cst_37 = arith.constant 5.000000e-01 : f32
    %76 = vector.broadcast %cst_37 : f32 to vector<64x64xf32>
    %77 = arith.mulf %76, %73 : vector<64x64xf32>
    %78 = math.tanh %77 : vector<64x64xf32>
    %cst_38 = arith.constant 1.000000e+00 : f32
    %79 = vector.broadcast %cst_38 : f32 to vector<64x64xf32>
    %80 = arith.addf %79, %78 : vector<64x64xf32>
    %81 = arith.mulf %75, %80 : vector<64x64xf32>
    %82 = vector.shape_cast %81 : vector<64x64xf32> to vector<8x8x64xf32>
    %83 = vector.shape_cast %15 : vector<1x64xf32> to vector<1x1x64xf32>
    %84 = vector.broadcast %83 : vector<1x1x64xf32> to vector<8x8x64xf32>
    %85 = arith.mulf %82, %84 : vector<8x8x64xf32>
    %cst_39 = arith.constant dense<0.000000e+00> : vector<8x8xf32>
    %86 = vector.multi_reduction <add>, %85, %cst_39 [2] : vector<8x8x64xf32> to vector<8x8xf32>
    %87 = vector.broadcast %16 : vector<1x1xf32> to vector<8x8xf32>
    %88 = arith.addf %86, %87 : vector<8x8xf32>
    %89 = vector.broadcast %9 : vector<8x1xf32> to vector<8x8xf32>
    %90 = arith.mulf %3, %89 : vector<8x8xf32>
    %cst_40 = arith.constant dense<0.000000e+00> : vector<8x8xf32>
    %91 = tpu.matmul %88, %90, %cst_40 {dimension_numbers = #tpu.dot_dimension_numbers<[1], [0], [0], [1], [0, 0, 1, 1], [], []>} : vector<8x8xf32>, vector<8x8xf32>, vector<8x8xf32> -> vector<8x8xf32>
    %cst_41 = arith.constant dense<0.000000e+00> : vector<8x1xf32>
    %92 = tpu.matmul %88, %9, %cst_41 {dimension_numbers = #tpu.dot_dimension_numbers<[1], [0], [0], [1], [0, 0, 1, 1], [], []>} : vector<8x8xf32>, vector<8x1xf32>, vector<8x1xf32> -> vector<8x1xf32>
    %c0_42 = arith.constant 0 : index
    %c0_43 = arith.constant 0 : index
    %93 = vector.load %arg19[%c0_42, %c0_43] : memref<8x8xf32, #tpu.memory_space<vmem>>, vector<8x8xf32>
    %94 = vector.broadcast %92 : vector<8x1xf32> to vector<8x8xf32>
    %95 = arith.mulf %94, %1 : vector<8x8xf32>
    %96 = arith.subf %95, %91 : vector<8x8xf32>
    %97 = arith.addf %93, %96 : vector<8x8xf32>
    %c0_44 = arith.constant 0 : index
    %c0_45 = arith.constant 0 : index
    %98 = vector.load %arg19[%c0_44, %c0_45] : memref<8x8xf32, #tpu.memory_space<vmem>>, vector<8x8xf32>
    tpu.vector_store %arg19[%c0_44, %c0_45], %97 {strides = array<i32>} : memref<8x8xf32, #tpu.memory_space<vmem>>, vector<8x8xf32>,
    %99 = vector.shape_cast %68 : vector<64x16xf32> to vector<8x8x16xf32>
    %100 = vector.shape_cast %9 : vector<8x1xf32> to vector<1x8x1xf32>
    %101 = vector.broadcast %100 : vector<1x8x1xf32> to vector<8x8x16xf32>
    %102 = arith.mulf %99, %101 : vector<8x8x16xf32>
    %c0_46 = arith.constant 0 : index
    %c0_47 = arith.constant 0 : index
    %103 = vector.load %arg20[%c0_46, %c0_47] : memref<8x16xf32, #tpu.memory_space<vmem>>, vector<8x16xf32>
    %cst_48 = arith.constant dense<0.000000e+00> : vector<8x16xf32>
    %104 = vector.multi_reduction <add>, %102, %cst_48 [1] : vector<8x8x16xf32> to vector<8x16xf32>
    %105 = arith.addf %103, %104 : vector<8x16xf32>
    %c0_49 = arith.constant 0 : index
    %c0_50 = arith.constant 0 : index
    %106 = vector.load %arg20[%c0_49, %c0_50] : memref<8x16xf32, #tpu.memory_space<vmem>>, vector<8x16xf32>
    tpu.vector_store %arg20[%c0_49, %c0_50], %105 {strides = array<i32>} : memref<8x16xf32, #tpu.memory_space<vmem>>, vector<8x16xf32>,
    %c2_i32 = arith.constant 2 : i32
    %107 = arith.cmpi eq, %arg2, %c2_i32 : i32
    %108 = arith.extui %107 : i1 to i32
    %c0_i32_51 = arith.constant 0 : i32
    %109 = arith.cmpi ne, %108, %c0_i32_51 : i32
    scf.if %109 {
      %c0_52 = arith.constant 0 : index
      %c0_53 = arith.constant 0 : index
      %c0_54 = arith.constant 0 : index
      %110 = vector.load %arg7[%c0_52, %c0_53, %c0_54] : memref<1x8x1xf32, #tpu.memory_space<vmem>>, vector<1x8x1xf32>
      %111 = vector.shape_cast %110 : vector<1x8x1xf32> to vector<8x1xf32>
      %c0_55 = arith.constant 0 : index
      %c0_56 = arith.constant 0 : index
      %112 = vector.load %arg19[%c0_55, %c0_56] : memref<8x8xf32, #tpu.memory_space<vmem>>, vector<8x8xf32>
      %113 = vector.broadcast %111 : vector<8x1xf32> to vector<8x8xf32>
      %114 = arith.mulf %112, %113 : vector<8x8xf32>
      %115 = arith.addf %1, %114 : vector<8x8xf32>
      %c0_57 = arith.constant 0 : index
      %c0_58 = arith.constant 0 : index
      %c0_59 = arith.constant 0 : index
      %116 = vector.load %arg17[%c0_57, %c0_58, %c0_59] : memref<1x8x8xf32, #tpu.memory_space<vmem>>, vector<1x8x8xf32>
      %117 = vector.shape_cast %116 : vector<1x8x8xf32> to vector<8x8xf32>
      %118 = vector.shape_cast %115 : vector<8x8xf32> to vector<1x8x8xf32>
      tpu.vector_store %arg17[%c0_57, %c0_58, %c0_59], %118 {strides = array<i32>} : memref<1x8x8xf32, #tpu.memory_space<vmem>>, vector<1x8x8xf32>,
      %c0_60 = arith.constant 0 : index
      %c0_61 = arith.constant 0 : index
      %119 = vector.load %arg20[%c0_60, %c0_61] : memref<8x16xf32, #tpu.memory_space<vmem>>, vector<8x16xf32>
      %120 = vector.broadcast %111 : vector<8x1xf32> to vector<8x16xf32>
      %121 = arith.mulf %119, %120 : vector<8x16xf32>
      %c0_62 = arith.constant 0 : index
      %c0_63 = arith.constant 0 : index
      %122 = vector.load %arg13[%c0_62, %c0_63] : memref<32x64xf32, #tpu.memory_space<vmem>>, vector<32x64xf32>
      %cst_64 = arith.constant dense<0.000000e+00> : vector<8x64xf32>
      %123 = tpu.matmul %5, %122, %cst_64 {dimension_numbers = #tpu.dot_dimension_numbers<[1], [0], [0], [1], [0, 0, 1, 1], [], []>} : vector<8x32xf32>, vector<32x64xf32>, vector<8x64xf32> -> vector<8x64xf32>
      %c0_65 = arith.constant 0 : index
      %c0_66 = arith.constant 0 : index
      %124 = vector.load %arg14[%c0_65, %c0_66] : memref<16x64xf32, #tpu.memory_space<vmem>>, vector<16x64xf32>
      %cst_67 = arith.constant dense<0.000000e+00> : vector<8x64xf32>
      %125 = tpu.matmul %121, %124, %cst_67 {dimension_numbers = #tpu.dot_dimension_numbers<[1], [0], [0], [1], [0, 0, 1, 1], [], []>} : vector<8x16xf32>, vector<16x64xf32>, vector<8x64xf32> -> vector<8x64xf32>
      %126 = arith.addf %123, %125 : vector<8x64xf32>
      %127 = vector.broadcast %17 : vector<1x64xf32> to vector<8x64xf32>
      %128 = arith.addf %126, %127 : vector<8x64xf32>
      %cst_68 = arith.constant 5.000000e-01 : f32
      %129 = vector.broadcast %cst_68 : f32 to vector<8x64xf32>
      %130 = arith.mulf %129, %128 : vector<8x64xf32>
      %cst_69 = arith.constant 5.000000e-01 : f32
      %131 = vector.broadcast %cst_69 : f32 to vector<8x64xf32>
      %132 = arith.mulf %131, %128 : vector<8x64xf32>
      %133 = math.tanh %132 : vector<8x64xf32>
      %cst_70 = arith.constant 1.000000e+00 : f32
      %134 = vector.broadcast %cst_70 : f32 to vector<8x64xf32>
      %135 = arith.addf %134, %133 : vector<8x64xf32>
      %136 = arith.mulf %130, %135 : vector<8x64xf32>
      %c0_71 = arith.constant 0 : index
      %c0_72 = arith.constant 0 : index
      %137 = vector.load %arg15[%c0_71, %c0_72] : memref<64x32xf32, #tpu.memory_space<vmem>>, vector<64x32xf32>
      %cst_73 = arith.constant dense<0.000000e+00> : vector<8x32xf32>
      %138 = tpu.matmul %136, %137, %cst_73 {dimension_numbers = #tpu.dot_dimension_numbers<[1], [0], [0], [1], [0, 0, 1, 1], [], []>} : vector<8x64xf32>, vector<64x32xf32>, vector<8x32xf32> -> vector<8x32xf32>
      %139 = vector.broadcast %18 : vector<1x32xf32> to vector<8x32xf32>
      %140 = arith.addf %138, %139 : vector<8x32xf32>
      %141 = arith.addf %140, %5 : vector<8x32xf32>
      %c0_74 = arith.constant 0 : index
      %c0_75 = arith.constant 0 : index
      %c0_76 = arith.constant 0 : index
      %142 = vector.load %arg18[%c0_74, %c0_75, %c0_76] : memref<1x8x32xf32, #tpu.memory_space<vmem>>, vector<1x8x32xf32>
      %143 = vector.shape_cast %142 : vector<1x8x32xf32> to vector<8x32xf32>
      %144 = vector.shape_cast %141 : vector<8x32xf32> to vector<1x8x32xf32>
      tpu.vector_store %arg18[%c0_74, %c0_75, %c0_76], %144 {strides = array<i32>} : memref<1x8x32xf32, #tpu.memory_space<vmem>>, vector<1x8x32xf32>,
    } else {
    }
    return
  }
  func.func @transform_0(%arg0: i32, %arg1: i32, %arg2: i32) -> (i32, i32, i32) {
    %c0_i32 = arith.constant 0 : i32
    %c0_i32_0 = arith.constant 0 : i32
    return %arg0, %arg1, %c0_i32 : i32, i32, i32
  }
  func.func @transform_1(%arg0: i32, %arg1: i32, %arg2: i32) -> (i32, i32, i32) {
    %c0_i32 = arith.constant 0 : i32
    %c0_i32_0 = arith.constant 0 : i32
    return %arg0, %arg2, %c0_i32 : i32, i32, i32
  }
  func.func @transform_2(%arg0: i32, %arg1: i32, %arg2: i32) -> (i32, i32, i32) {
    %c0_i32 = arith.constant 0 : i32
    %c0_i32_0 = arith.constant 0 : i32
    return %arg0, %arg1, %c0_i32 : i32, i32, i32
  }
  func.func @transform_3(%arg0: i32, %arg1: i32, %arg2: i32) -> (i32, i32, i32) {
    %c0_i32 = arith.constant 0 : i32
    %c0_i32_0 = arith.constant 0 : i32
    return %arg0, %arg2, %c0_i32 : i32, i32, i32
  }
  func.func @transform_4(%arg0: i32, %arg1: i32, %arg2: i32) -> (i32, i32, i32) {
    %c0_i32 = arith.constant 0 : i32
    %c0_i32_0 = arith.constant 0 : i32
    return %arg0, %arg1, %c0_i32 : i32, i32, i32
  }
  func.func @transform_5(%arg0: i32, %arg1: i32, %arg2: i32) -> (i32, i32, i32) {
    %c0_i32 = arith.constant 0 : i32
    %c0_i32_0 = arith.constant 0 : i32
    return %arg0, %arg2, %c0_i32 : i32, i32, i32
  }
  func.func @transform_6(%arg0: i32, %arg1: i32, %arg2: i32) -> (i32, i32) {
    %c0_i32 = arith.constant 0 : i32
    %c0_i32_0 = arith.constant 0 : i32
    %c0_i32_1 = arith.constant 0 : i32
    return %c0_i32, %c0_i32_0 : i32, i32
  }
  func.func @transform_7(%arg0: i32, %arg1: i32, %arg2: i32) -> (i32, i32) {
    %c0_i32 = arith.constant 0 : i32
    %c0_i32_0 = arith.constant 0 : i32
    %c0_i32_1 = arith.constant 0 : i32
    return %c0_i32, %c0_i32_0 : i32, i32
  }
  func.func @transform_8(%arg0: i32, %arg1: i32, %arg2: i32) -> (i32, i32) {
    %c0_i32 = arith.constant 0 : i32
    %c0_i32_0 = arith.constant 0 : i32
    %c0_i32_1 = arith.constant 0 : i32
    return %c0_i32, %c0_i32_0 : i32, i32
  }
  func.func @transform_9(%arg0: i32, %arg1: i32, %arg2: i32) -> (i32, i32) {
    %c0_i32 = arith.constant 0 : i32
    %c0_i32_0 = arith.constant 0 : i32
    %c0_i32_1 = arith.constant 0 : i32
    return %c0_i32, %c0_i32_0 : i32, i32
  }
  func.func @transform_10(%arg0: i32, %arg1: i32, %arg2: i32) -> (i32, i32) {
    %c0_i32 = arith.constant 0 : i32
    %c0_i32_0 = arith.constant 0 : i32
    %c0_i32_1 = arith.constant 0 : i32
    return %c0_i32, %c0_i32_0 : i32, i32
  }
  func.func @transform_11(%arg0: i32, %arg1: i32, %arg2: i32) -> (i32, i32) {
    %c0_i32 = arith.constant 0 : i32
    %c0_i32_0 = arith.constant 0 : i32
    %c0_i32_1 = arith.constant 0 : i32
    return %c0_i32, %c0_i32_0 : i32, i32
  }
  func.func @transform_12(%arg0: i32, %arg1: i32, %arg2: i32) -> (i32, i32) {
    %c0_i32 = arith.constant 0 : i32
    %c0_i32_0 = arith.constant 0 : i32
    %c0_i32_1 = arith.constant 0 : i32
    return %c0_i32, %c0_i32_0 : i32, i32
  }
  func.func @transform_13(%arg0: i32, %arg1: i32, %arg2: i32) -> (i32, i32) {
    %c0_i32 = arith.constant 0 : i32
    %c0_i32_0 = arith.constant 0 : i32
    %c0_i32_1 = arith.constant 0 : i32
    return %c0_i32, %c0_i32_0 : i32, i32
  }
  func.func @transform_14(%arg0: i32, %arg1: i32, %arg2: i32) -> (i32, i32, i32) {
    %c0_i32 = arith.constant 0 : i32
    %c0_i32_0 = arith.constant 0 : i32
    return %arg0, %arg1, %c0_i32 : i32, i32, i32
  }
  func.func @transform_15(%arg0: i32, %arg1: i32, %arg2: i32) -> (i32, i32, i32) {
    %c0_i32 = arith.constant 0 : i32
    %c0_i32_0 = arith.constant 0 : i32
    return %arg0, %arg1, %c0_i32 : i32, i32, i32
  }
}

</mosaic_0001>

<bundles_post_ra>
// kernel: tpu_custom_call.1
= control target key start
LH: loop header
LB: loop body
LE: loop exit
PB: predicated region body
PF: predicated region fallthrough
CT: control target
= control target key end

     0   :  { %s3067_s0 = inlined_call_operand.vmem [shape: f32[2,24,8], index: 0, kind: input, shape index: {}]   ;;  %s3068_s1 = inlined_call_operand.vmem [shape: f32[2,24,8], index: 1, kind: input, shape index: {}]   ;;  %s3069_s2 = inlined_call_operand.vmem [shape: f32[2,24,32], index: 2, kind: input, shape index: {}]   ;;  %s3070_s3 = inlined_call_operand.vmem [shape: f32[2,24,32], index: 3, kind: input, shape index: {}]   ;;  %s3071_s4 = inlined_call_operand.vmem [shape: f32[2,24,1], index: 4, kind: input, shape index: {}]   ;;  %s3072_s5 = inlined_call_operand.vmem [shape: f32[2,24,1], index: 5, kind: input, shape index: {}]   ;;  %s3073_s6 = inlined_call_operand.vmem [shape: bf16[32,256], index: 6, kind: input, shape index: {}]   ;;  %s3074_s7 = inlined_call_operand.vmem [shape: bf16[32,256], index: 7, kind: input, shape index: {}]   ;;  %s3075_s8 = inlined_call_operand.vmem [shape: bf16[256,16], index: 8, kind: input, shape index: {}]   ;;  %s3076_s9 = inlined_call_operand.vmem [shape: bf16[16,64], index: 9, kind: input, shape index: {}]   ;;  %s3077_s10 = inlined_call_operand.vmem [shape: f32[32,64], index: 10, kind: input, shape index: {}]   ;;  %s3078_s11 = inlined_call_operand.vmem [shape: f32[16,64], index: 11, kind: input, shape index: {}]   ;;  %s3079_s12 = inlined_call_operand.vmem [shape: f32[64,32], index: 12, kind: input, shape index: {}]   ;;  %s3080_s13 = inlined_call_operand.vmem [shape: f32[8,256], index: 13, kind: input, shape index: {}]   ;;  %s3081_s14 = inlined_call_operand.vmem [shape: f32[2,24,8], index: 14, kind: output, shape index: {0}]   ;;  %s3082_s15 = inlined_call_operand.hbm [shape: f32[2,24,32], index: 15, kind: output, shape index: {1}]  }
   0x1   :  { %3102 = sst [smem:[#allocation23_spill]] %s3067_s0 }
   0x2   :  { %3103 = sst [smem:[#allocation24_spill]] %s3068_s1 }
   0x3   :  { %3104 = sst [smem:[#allocation25_spill]] %s3078_s11 }
   0x4   :  { %3105 = sst [smem:[#allocation26_spill]] %s3079_s12 }
   0x5   :  { %3106 = sst [smem:[#allocation27_spill]] %s3080_s13 }
   0x6   :  { %3107 = sst [smem:[#allocation28_spill]] %s3082_s15 }
   0x7   :  { %21 = vsyncpa [#allocation6], 0 }
   0x8   :  { %23 = vsyncpa [#allocation6 + $0x1], 0  ;;  %s2500_s18 = smov 0   ;;  %s2502_s19 = smov 0  }
   0x9   :  { %s2504_s20 = smov 0   ;;  %s2506_s21 = smov 0  }
   0xa   :  { %s2508_s22 = smov 0   ;;  %s2510_s23 = smov 0  }
   0xb   :  { %s2512_s24 = smov 0   ;;  %s2514_s25 = smov 0  }
   0xc   :  { %s2516_s26 = smov 0   ;;  %s2518_s27 = smov 0  }
   0xd LB: > { %3108 = sst [smem:[#allocation8_spill]] %s2379_s18  ;;  %s1980_s28 = sadd.s32 4294967295, %s2415_s27   ;;  %s2415_s27 = sphi %s2518_s27, %s29_s27   ;;  %s2411_s26 = sphi %s2516_s26, %s3149_s26   ;;  %s2407_s25 = sphi %s2514_s25, %s3148_s25   ;;  %s2403_s24 = sphi %s2512_s24, %s3147_s24   ;;  %s2399_s23 = sphi %s2510_s23, %s3146_s23   ;;  %s2395_s22 = sphi %s2508_s22, %s3145_s22   ;;  %s2391_s21 = sphi %s2506_s21, %s3144_s21   ;;  %s2387_s20 = sphi %s2504_s20, %s3143_s20   ;;  %s2383_s19 = sphi %s2502_s19, %s3142_s19   ;;  %s2379_s18 = sphi %s2500_s18, %s3141_s18  }
   0xe   : > { %3109 = sst [smem:[#allocation9_spill]] %s2383_s19  ;;  %s1981_s29 = sadd.s32 4294967294, %s2415_s27  }
   0xf   : > { %3110 = sst [smem:[#allocation10_spill]] %s2387_s20  ;;  %s41_s30 = sadd.s32 1, %s2403_s24 }
  0x10   : > { %3111 = sst [smem:[#allocation11_spill]] %s2395_s22  ;;  %p42_p0 = scmp.ge.s32.totalorder %s41_s30, 3 }
  0x11   : > { %3112 = sst [smem:[#allocation12_spill]] %s2399_s23  ;;  %s44_s16 = sadd.s32 1, %s2407_s25 }
  0x12   : > { %3113 = sst [smem:[#allocation13_spill]] %s2403_s24  ;;  %s48_s17 = sadd.s32 1, %s2411_s26 }
  0x13   : > { %3114 = sst [smem:[#allocation14_spill]] %s2407_s25  ;;  %p431_p1 = scmp.ne.s32.totalorder %s2387_s20, %s2383_s19 }
  0x14   : > { %3115 = sst [smem:[#allocation15_spill]] %s2411_s26  ;;  %s3151_s30 = smov (%p42_p0, %s41_s30), 0 }
  0x15   : > { %3116 = sst [smem:[#allocation16_spill]] %s2415_s27  ;;  %s3153_s16 = smov (!%p42_p0, %s44_s16), %s2407_s25 }
  0x16   : > { %3117 = sst [smem:[#allocation17_spill]] %s3151_s30  ;;  %p432_p2 = scmp.eq.s32.totalorder %s1980_s28, 17 }
  0x17   : > { %p437_p3 = scmp.ne.s32.totalorder %s2383_s19, %s2379_s18  ;;  %p46_p4 = scmp.ge.s32.totalorder %s3153_s16, 3 }
  0x18   : > { %p438_p5 = scmp.eq.s32.totalorder %s1981_s29, 17  ;;  %p2562_p6 = por %p432_p2, %p431_p1 }
  0x19   : > { %s3155_s16 = smov (%p46_p4, %s3153_s16), 0  ;;  %s3157_s17 = smov (!%p46_p4, %s48_s17), %s2411_s26 }
  0x1a   : > { %s3118_s15 = scalar_select %p2562_p6, 1, 0 }
  0x1b   : > { %3120 = sst [smem:[#allocation19_spill]] %s3155_s16  ;;  %p2569_p7 = por %p438_p5, %p437_p3 }
  0x1c   : > { %3119 = sst [smem:[#allocation18_spill]] %s3118_s15  ;;  %p1984_p8 = scmp.ge.s32.totalorder %s2415_s27, 1 }
  0x1d   : > { %s3121_s24 = scalar_select %p2569_p7, 1, 0 }
  0x1e   : > { %p50_p9 = scmp.ge.s32.totalorder %s3157_s17, 2  ;;  %p546_p10 = scmp.lt.s32.totalorder %s2415_s27, 19 }
  0x1f   : > { %3122 = sst [smem:[#allocation20_spill]] %s3121_s24  ;;  %s417_s28 = ssub.s32 %s2407_s25, %s3155_s16 }
  0x20   : > { %s3159_s17 = smov (%p50_p9, %s3157_s17), 0  ;;  %p547_p11 = pnand %p1984_p8, %p546_p10 }
  0x21   : > { %3123 = sst [smem:[#allocation21_spill]] %s3159_s17  ;;  %s416_s29 = ssub.s32 %s2411_s26, %s3159_s17 }
  0x22   : > { %s418_s30 = sor.u32 %s417_s28, %s416_s29  ;;  %s421_s18 = sadd.s32 1, %s2387_s20 }
  0x23   : > { %p419_p12 = scmp.eq.s32.totalorder %s418_s30, 0  ;;  %550 = sbr.rel (%p547_p11) target bundleno = 1658 (0x67a), region = 76 }
  0x24   : > { %s3096_s16 = sand.u32 (!%p547_p11), 1, %s2383_s19   ;;  %p645_p13 = scmp.lt.s32.totalorder (!%p547_p11), %s2399_s23, 1 }
  0x25   : > { %s2583_s15 = scalar_select %p419_p12, %s2387_s20, %s421_s18  }
  0x26   : > { %s3125_s13 = sld [smem:[#allocation27_spill]] (!%p547_p11)  ;;  %s2599_s18 = sshll.u32 (!%p547_p11), %s3096_s16, 3 }
  0x27   : > { %3124 = sst [smem:[#allocation22_spill]] %s2583_s15  ;;  %p647_p0 = scmp.lt.s32.totalorder (!%p547_p11), %s2395_s22, 2 }
  0x28   : > { %p655_p1 = scmp.lt.s32.totalorder %s2391_s21, 2  ;;  %s3126_s0 = sld [smem:[#allocation23_spill]] }
  0x29   : > { %s646_s29 = scalar_select %p645_p13, %s2399_s23, 1 }
  0x2a   : > { %s648_s17 = scalar_select %p647_p0, %s2395_s22, 2 }
  0x2b   : > { %s2139_s26 = smul.u32 3, %s646_s29  ;;  %s3127_s1 = sld [smem:[#allocation24_spill]] }
  0x2c   : > { %v2590_v0 = vld [vmem:[%s3125_s13] sm:$0xff]  ;;  %v2595_v1 = vld [vmem:[%s3125_s13 + $0x8] sm:$0xff]  ;;  %s656_s15 = scalar_select %p655_p1, %s2391_s21, 2 }
  0x2d   : > { %s650_s20 = sadd.s32 %s2139_s26, %s648_s17  ;;  %s644_s12 = scalar_lea.vmem [#allocation5], %s2599_s18 }
  0x2e   : > { %s2606_s27 = sshll.u32 %s650_s20, 3  ;;  %s658_s24 = sadd.s32 %s2139_s26, %s656_s15 }
  0x2f   : > { %s652_s30 = scalar_lea.vmem %s3126_s0, %s2606_s27  ;;  %s1987_s16 = sshll.u32 %s658_s24, 3 }
  0x30   : > { %s668_s17 = scalar_lea.vmem %s3069_s2, %s2606_s27  ;;  %v2619_v2 = vld [vmem:[%s652_s30] sm:$0xff]  ;;  %s676_s11 = scalar_lea.vmem %s3070_s3, %s1987_s16 }
  0x31   : > { %s660_s22 = scalar_lea.vmem %s3127_s1, %s1987_s16  ;;  %s684_s25 = scalar_lea.vmem %s3071_s4, %s2606_s27  ;;  %v2630_v4 = vld [vmem:[%s668_s17] sm:$0xff] }
  0x32   : > { %v2628_v3 = vld [vmem:[%s660_s22] sm:$0xff]  ;;  %s692_s24 = scalar_lea.vmem %s3072_s5, %s1987_s16  ;;  %s700_s30 = scalar_lea.vmem %s3081_s14, %s2606_s27 }
  0x33   : > { %v2639_v5 = vld [vmem:[%s676_s11] sm:$0xff]  ;;  %p1993_p2 = scmp.ne.s32.totalorder %s2391_s21, 0 }
  0x34   : > { %v2641_v6 = vld [vmem:[%s692_s24] sm:$0xff] }
  0x35   : > { %712 = sbr.rel (%p1993_p2) target bundleno = 203 (0xcb), region = 80 }
  0x3a   : > { %v2004_v7 = vld [vmem:[%s3073_s6 + $0x10] sm:$0xf]  ;;  %v2117_v8 = vld [vmem:[%s3073_s6 + $0x14] sm:$0xf0]  ;;  %v2116_v9 = vld [vmem:[%s3073_s6 + $0x14] sm:$0xf]  ;;  %v717_v10 = vmul.f32 %v2619_v2, %v2619_v2  ;;  %v721_v22 = vpack.c.bf16 %v2630_v4, %v2630_v4 }
  0x3b   : > { %v2005_v11 = vor.u32 %v2117_v8, %v2004_v7  ;;  %v2006_v12 = vld [vmem:[%s3073_s6 + $0x18] sm:$0xf0]  ;;  %v1996_v13 = vld [vmem:[%s3073_s6] sm:$0xf]  ;;  %v2115_v14 = vld [vmem:[%s3073_s6 + $0x4] sm:$0xf0] }
  0x3c   : > { %v2009_v15 = vor.u32 %v2116_v9, %v2006_v12  ;;  %v2114_v16 = vld [vmem:[%s3073_s6 + $0x4] sm:$0xf]  ;;  %v1998_v17 = vld [vmem:[%s3073_s6 + $0x8] sm:$0xf0]  ;;  %vm713_vm0 = vcmask 64512   ;;  %v1997_v18 = vor.u32 %v2115_v14, %v1996_v13  ;;  %vm715_vm1 = vcmask 130048  }
  0x3d   : > { %758 = vmatpush.bf16.msra.mxu0 %v2005_v11  ;;  %v718_v19 = vsel %vm713_vm0, %v717_v10, 0.0  ;;  %v2001_v20 = vor.u32 %v2114_v16, %v1998_v17  ;;  %v2417_v21 = vmov 0.0   ;;  %vm748_vm2 = vcmask 261120  }
  0x3e   : > { %771 = vmatpush.bf16.msra.mxu1 %v2009_v15  ;;  %714 = vst.msk [vmem:[#allocation2] sm:$0xff] %vm713_vm0, %v2417_v21  ;;  %719 = vadd.xlane.f32.xlu0 %v718_v19  ;;  %v778_v23 = vperm.slane %v2590_v0, 0  ;;  %v779_v25 = vperm.slane %v2595_v1, 0  ;;  %v726_v26 = vperm.slane %v2590_v0, 1  ;;  %v727_v27 = vperm.slane %v2595_v1, 1 }
  0x3f   : > { %716 = vst.msk [vmem:[#allocation3] sm:$0xff] %vm715_vm1, %v2417_v21 }
  0x41   : > { %759 = vmatpush.bf16.msra.mxu0 %v1997_v18 }
  0x42   : > { %772 = vmatpush.bf16.msra.mxu1 %v2001_v20 }
  0x44   : > { %2010 = vmatmul.msk.bf16.vlgmr.msra.gmra.mxu0 %vm748_vm2, %v721_v22 }
  0x45   : > { %2011 = vmatmul.msk.bf16.vlgmr.msra.gmra.mxu1 %vm748_vm2, %v721_v22 }
  0xb1   : > { %v720_v24 = vpop.xlane.xlu0 %719 }
  0xb2   : > { %v780_v28 = vmul.f32 %v778_v23, %v720_v24  ;;  %v781_v29 = vmul.f32 %v779_v25, %v720_v24 }
  0xc1   : > { %v761_v30 = vpop.f32.mrf.mxu0 }
  0xc2   : > { %v762_v31 = vadd.f32 %v761_v30, %v726_v26  ;;  %v774_v32 = vpop.f32.mrf.mxu1 }
  0xc3   : > { %v775_v33 = vadd.f32 %v774_v32, %v727_v27 }
  0xc4   : > { %v782_v34 = vadd.f32 %v780_v28, %v762_v31 }
  0xc5   : > { %v783_v35 = vadd.f32 %v781_v29, %v775_v33 }
  0xc6   : > { %784 = vst [vmem:[#allocation4] sm:$0xff] %v782_v34 }
  0xc7   : > { %785 = vst [vmem:[#allocation4 + $0x8] sm:$0xff] %v783_v35 }
  0xc9   : > { %v763_v36 = vpop.f32.mrf.mxu0 }
  0xca   : > { %v776_v37 = vpop.f32.mrf.mxu1 }
  0xcb PF: > { %v2120_v38 = vld [vmem:[%s3074_s7 + $0x14] sm:$0xf]  ;;  %v2024_v39 = vld [vmem:[%s3074_s7 + $0x18] sm:$0xf0]  ;;  %v2118_v40 = vld [vmem:[%s3074_s7 + $0x4] sm:$0xf]  ;;  %v788_v41 = vmul.f32 %v2628_v3, %v2628_v3  ;;  %v793_v52 = vpack.c.bf16 %v2639_v5, %v2639_v5  ;;  %v880_v53 = vlaneseq }
  0xcc   : > { %v2027_v42 = vor.u32 %v2120_v38, %v2024_v39  ;;  %v2016_v43 = vld [vmem:[%s3074_s7 + $0x8] sm:$0xf0]  ;;  %vm789_vm3 = vcmask 64512   ;;  %v2022_v44 = vld [vmem:[%s3074_s7 + $0x10] sm:$0xf]  ;;  %vm822_vm4 = vcmask 261120  }
  0xcd   : > { %v790_v45 = vsel %vm789_vm3, %v788_v41, 0.0  ;;  %v2121_v46 = vld [vmem:[%s3074_s7 + $0x14] sm:$0xf0]  ;;  %v2014_v47 = vld [vmem:[%s3074_s7] sm:$0xf]  ;;  %v2019_v48 = vor.u32 %v2118_v40, %v2016_v43  ;;  %v881_v54 = vshrl.u32 %v880_v53, 7 }
  0xce   : > { %845 = vmatpush.bf16.msra.mxu1 %v2027_v42  ;;  %791 = vadd.xlane.f32.xlu0 %v790_v45  ;;  %v2023_v49 = vor.u32 %v2121_v46, %v2022_v44  ;;  %v2119_v50 = vld [vmem:[%s3074_s7 + $0x4] sm:$0xf0]  ;;  %v2129_v11 = vld [vmem:[%s3075_s8 + $0x38] sm:$0xff]  ;;  %v2128_v13 = vld [vmem:[%s3075_s8 + $0x30] sm:$0xff]  ;;  %vm940_vm5 = vcmask 1041409   ;;  %v2770_v30 = vperm.slane %v2595_v1, 0 }
  0xcf   : > { %v2015_v51 = vor.u32 %v2119_v50, %v2014_v47  ;;  %2235 = vset.pattern.permute.xlu2 %v881_v54  ;;  %2234 = vset.pattern.permute.xlu1 %v881_v54  ;;  %v2137_v12 = vld [vmem:[%s3075_s8 + $0x78] sm:$0xff]  ;;  %v2136_v14 = vld [vmem:[%s3075_s8 + $0x70] sm:$0xff]  ;;  %v2127_v15 = vld [vmem:[%s3075_s8 + $0x28] sm:$0xff]  ;;  %v2776_v33 = vperm.slane %v2590_v0, 0  ;;  %vm938_vm6 = vcmask 1040384   ;;  %vm946_vm7 = vcmask 1043459  }
  0xd0   : > { %832 = vmatpush.bf16.msra.mxu0 %v2023_v49  ;;  %2233 = vset.pattern.permute.xlu0 %v881_v54  ;;  %v2135_v16 = vld [vmem:[%s3075_s8 + $0x68] sm:$0xff]  ;;  %v2126_v17 = vld [vmem:[%s3075_s8 + $0x20] sm:$0xff]  ;;  %v2125_v19 = vld [vmem:[%s3075_s8 + $0x18] sm:$0xff]  ;;  %vm943_vm8 = vcmask 1042434   ;;  %vm952_vm9 = vcmask 1045509   ;;  %vm949_vm10 = vcmask 1044484  }
  0xd1   : > { %1242 = vmatpush.bf16.msra.mxu3 %v2129_v11  ;;  %1271 = vmatpush.bf16.msra.mxu2 %v2137_v12  ;;  %v2134_v18 = vld [vmem:[%s3075_s8 + $0x60] sm:$0xff]  ;;  %v2133_v20 = vld [vmem:[%s3075_s8 + $0x58] sm:$0xff]  ;;  %v2124_v21 = vld [vmem:[%s3075_s8 + $0x10] sm:$0xff]  ;;  %vm958_vm11 = vcmask 1046528   ;;  %vm955_vm12 = vcmask 1046534   ;;  %vm1345_vm13 = vcmask 130048  }
  0xd2   : > { %846 = vmatpush.bf16.msra.mxu1 %v2019_v48  ;;  %v2132_v22 = vld [vmem:[%s3075_s8 + $0x50] sm:$0xff]  ;;  %v2123_v23 = vld [vmem:[%s3075_s8 + $0x8] sm:$0xff]  ;;  %v787_v25 = vld [vmem:[#allocation4 + $0x8] sm:$0xff]  ;;  %vm1428_vm14 = vcmask 523264   ;;  %vm1496_vm15 = vcmask 1047559   ;;  %p2106_p3 = scmp.ne.s32.totalorder %s2391_s21, 2 }
  0xd3   : > { %v2131_v24 = vld [vmem:[%s3075_s8 + $0x48] sm:$0xff]  ;;  %v2759_v26 = vrot.slane %v787_v25, 7  ;;  %v2122_v27 = vld [vmem:[%s3075_s8] sm:$0xff]  ;;  %v2767_v29 = vld [vmem:[#allocation4] sm:$0xff]  ;;  %s3128_s19 = sld [smem:[#allocation25_spill]] (!%p2106_p3) }
  0xd4   : > { %833 = vmatpush.bf16.msra.mxu0 %v2015_v51  ;;  %v2130_v28 = vld [vmem:[%s3075_s8 + $0x40] sm:$0xff]  ;;  %s3130_s26 = sld [smem:[#allocation26_spill]] (!%p2106_p3) }
  0xd5   : > { %2029 = vmatmul.msk.bf16.vlgmr.msra.gmra.mxu1 %vm822_vm4, %v793_v52  ;;  %1243 = vmatpush.bf16.msra.mxu3 %v2128_v13  ;;  %v941_v32 = vsel %vm940_vm5, %v2767_v29, %v2759_v26  ;;  %v939_v1 = vsel %vm938_vm6, %v2767_v29, %v2759_v26  ;;  %v947_v37 = vsel %vm946_vm7, %v2767_v29, %v2759_v26 }
  0xd6   : > { %2030 = vmatpush.xpose.msk.msrb.mxu1 %vm789_vm3, %v2628_v3  ;;  %1272 = vmatpush.bf16.msra.mxu2 %v2136_v14  ;;  %v942_v35 = vrot.slane %v941_v32, 1  ;;  %v944_v41 = vsel %vm943_vm8, %v2767_v29, %v2759_v26  ;;  %v961_v42 = vperm.slane %v939_v1, 0  ;;  %v962_v43 = vperm.slane %v939_v1, 1 }
  0xd7   : > { %2028 = vmatmul.msk.bf16.vlgmr.msra.gmra.mxu0 %vm822_vm4, %v793_v52  ;;  %v948_v45 = vrot.slane %v947_v37, 3  ;;  %v945_v47 = vrot.slane %v944_v41, 2  ;;  %v950_v37 = vsel %vm949_vm10, %v2767_v29, %v2759_v26 }
  0xd8   : > { %v963_v39 = vperm.slane %v942_v35, 0  ;;  %v964_v40 = vperm.slane %v942_v35, 1  ;;  %v953_v35 = vsel %vm952_vm9, %v2767_v29, %v2759_v26 }
  0xd9   : > { %1244 = vmatpush.bf16.msra.mxu3 %v2127_v15  ;;  %v966_v11 = vperm.slane %v945_v47, 1  ;;  %v968_v12 = vperm.slane %v948_v45, 1  ;;  %s3129_s28 = smov (!%p2106_p3), %s3128_s19 }
  0xda   : > { %1273 = vmatpush.bf16.msra.mxu2 %v2135_v16  ;;  %s3131_s13 = smov (!%p2106_p3), %s3130_s26 }
  0xdd   : > { %1245 = vmatpush.bf16.msra.mxu3 %v2126_v17 }
  0xde   : > { %1274 = vmatpush.bf16.msra.mxu2 %v2134_v18 }
  0xe1   : > { %1246 = vmatpush.bf16.msra.mxu3 %v2125_v19 }
  0xe2   : > { %1275 = vmatpush.bf16.msra.mxu2 %v2133_v20 }
  0xe5   : > { %2031 = vmatmul.msk.f32.vlgmr.msrb.gmra.mxu1 %vm789_vm3, %v2619_v2  ;;  %1247 = vmatpush.bf16.msra.mxu3 %v2124_v21 }
  0xe6   : > { %1276 = vmatpush.bf16.msra.mxu2 %v2132_v22 }
  0xe9   : > { %1248 = vmatpush.bf16.msra.mxu3 %v2123_v23 }
  0xea   : > { %1277 = vmatpush.bf16.msra.mxu2 %v2131_v24 }
  0xed   : > { %1249 = vmatpush.bf16.msra.mxu3 %v2122_v27 }
  0xee   : > { %1278 = vmatpush.bf16.msra.mxu2 %v2130_v28 }
 0x141   : > { %v792_v31 = vpop.xlane.xlu0 %791 }
 0x142   : > { %v801_v34 = vmul.f32 %v2770_v30, %v792_v31  ;;  %v800_v36 = vmul.f32 %v2776_v33, %v792_v31 }
 0x152   : > { %v2713_v55 = vpop.f32.mrf.mxu1 }
 0x153   : > { %v2786_v38 = vadd.f32 %v2713_v55, %v801_v34 }
 0x154   : > { %v2715_v57 = vpop.f32.mrf.mxu0 }
 0x155   : > { %v2792_v44 = vadd.f32 %v2715_v57, %v800_v36  ;;  %v996_v49 = vadd.f32 %v964_v40, %v2786_v38  ;;  %v994_v55 = vadd.f32 %v962_v43, %v2786_v38  ;;  %v998_v20 = vadd.f32 %v966_v11, %v2786_v38 }
 0x156   : > { %v1000_v22 = vadd.f32 %v968_v12, %v2786_v38 }
 0x157   : > { %v995_v48 = vadd.f32 %v963_v39, %v2792_v44  ;;  %v993_v54 = vadd.f32 %v961_v42, %v2792_v44 }
 0x15a   : > { %v850_v56 = vpop.f32.mrf.mxu1 }
 0x15c   : > { %v837_v63 = vpop.f32.mrf.mxu0 }
 0x15d   : > { %v965_v63 = vperm.slane %v945_v47, 0  ;;  %v954_v47 = vrot.slane %v953_v35, 5 }
 0x15f   : > { %v997_v15 = vadd.f32 %v965_v63, %v2792_v44 }
 0x162   : > { %v875_v58 = vpop.f32.mrf.mxu1 }
 0x163   : > { %v878_v59 = vmul.f32 -2.0, %v875_v58 }
 0x165   : > { %v900_v60 = vperm.slane %v878_v59, 3  ;;  %v886_v61 = vperm.slane %v878_v59, 1  ;;  %v879_v62 = vperm.slane %v878_v59, 0  ;;  %v907_v5 = vperm.slane %v878_v59, 4 }
 0x166   : > { %v893_v7 = vperm.slane %v878_v59, 2  ;;  %v921_v8 = vperm.slane %v878_v59, 6  ;;  %v914_v9 = vperm.slane %v878_v59, 5  ;;  %v928_v10 = vperm.slane %v878_v59, 7 }
 0x167   : > { %905 = vperm.xlu2 %2235, %v900_v60   ;;  %891 = vperm.xlu1 %2234, %v886_v61   ;;  %v967_v60 = vperm.slane %v948_v45, 0 }
 0x168   : > { %884 = vperm.xlu0 %2233, %v879_v62  }
 0x169   : > { %v999_v13 = vadd.f32 %v967_v60, %v2792_v44 }
 0x16f   : > { %912 = vperm.xlu2 %2235, %v907_v5   ;;  %898 = vperm.xlu1 %2234, %v893_v7  }
 0x177   : > { %926 = vperm.xlu2 %2235, %v921_v8   ;;  %919 = vperm.xlu1 %2234, %v914_v9  }
 0x17f   : > { %933 = vperm.xlu1 %2234, %v928_v10  }
 0x1c1   : > { %v906_v8 = vpop.permute.xlu2 %905 }
 0x1c2   : > { %v1015_v16 = vmul.f32 %v906_v8, %v2776_v33  ;;  %v1016_v19 = vmul.f32 %v906_v8, %v2770_v30 }
 0x1c4   : > { %v1031_v25 = vadd.f32 %v1015_v16, %v999_v13  ;;  %v1032_v28 = vadd.f32 %v1016_v19, %v1000_v22  ;;  %v959_v22 = vsel %vm958_vm11, %v2759_v26, %v2767_v29 }
 0x1c5   : > { %v960_v35 = vrot.slane %v959_v22, 7 }
 0x1c6   : > { %v1047_v42 = vmul.f32 0.5, %v1031_v25 }
 0x1d9   : > { %v892_v46 = vpop.permute.xlu1 %891 }
 0x1da   : > { %v1011_v50 = vmul.f32 %v892_v46, %v2776_v33  ;;  %v1012_v51 = vmul.f32 %v892_v46, %v2770_v30  ;;  %v885_v52 = vpop.permute.xlu0 %884  ;;  %v1048_v46 = vmul.f32 0.5, %v1032_v28  ;;  %v956_v28 = vsel %vm955_vm12, %v2767_v29, %v2759_v26 }
 0x1db   : > { %v1009_v56 = vmul.f32 %v885_v52, %v2776_v33  ;;  %v1010_v57 = vmul.f32 %v885_v52, %v2770_v30 }
 0x1dc   : > { %v1027_v58 = vadd.f32 %v1011_v50, %v995_v48  ;;  %v1028_v59 = vadd.f32 %v1012_v51, %v996_v49  ;;  %v951_v49 = vrot.slane %v950_v37, 4  ;;  %v957_v37 = vrot.slane %v956_v28, 6 }
 0x1dd   : > { %v1025_v61 = vadd.f32 %v1009_v56, %v993_v54  ;;  %v1026_v62 = vadd.f32 %v1010_v57, %v994_v55  ;;  %v971_v55 = vperm.slane %v954_v47, 0  ;;  %v913_v57 = vpop.permute.xlu2 %912 }
 0x1de   : > { %v1043_v5 = vmul.f32 0.5, %v1027_v58  ;;  %v1044_v7 = vmul.f32 0.5, %v1028_v59  ;;  %v969_v54 = vperm.slane %v951_v49, 0  ;;  %v972_v58 = vperm.slane %v954_v47, 1 }
 0x1df   : > { %v1041_v9 = vmul.f32 0.5, %v1025_v61  ;;  %v1042_v10 = vmul.f32 0.5, %v1026_v62  ;;  %v970_v60 = vperm.slane %v951_v49, 1  ;;  %v976_v47 = vperm.slane %v960_v35, 1 }
 0x1e0   : > { %2238 = vtanh.f32 %v1043_v5  ;;  %v1001_v63 = vadd.f32 %v969_v54, %v2792_v44  ;;  %v974_v29 = vperm.slane %v957_v37, 1 }
 0x1e1   : > { %2240 = vtanh.f32 %v1044_v7  ;;  %v899_v14 = vpop.permute.xlu1 %898 }
 0x1e2   : > { %2242 = vtanh.f32 %v1041_v9  ;;  %v1013_v17 = vmul.f32 %v899_v14, %v2776_v33  ;;  %v1014_v18 = vmul.f32 %v899_v14, %v2770_v30  ;;  %v1002_v14 = vadd.f32 %v970_v60, %v2786_v38 }
 0x1e3   : > { %2244 = vtanh.f32 %v1042_v10 }
 0x1e4   : > { %v1029_v21 = vadd.f32 %v1013_v17, %v997_v15  ;;  %v1030_v23 = vadd.f32 %v1014_v18, %v998_v20 }
 0x1e6   : > { %v2239_v24 = vpop.eup %2238  ;;  %v1045_v34 = vmul.f32 0.5, %v1029_v21  ;;  %v1046_v39 = vmul.f32 0.5, %v1030_v23 }
 0x1e7   : > { %v2241_v27 = vpop.eup %2240  ;;  %v1075_v31 = vadd.f32 1.0, %v2239_v24 }
 0x1e8   : > { %v2243_v32 = vpop.eup %2242  ;;  %v1076_v36 = vadd.f32 1.0, %v2241_v27  ;;  %2246 = vtanh.f32 %v1045_v34 }
 0x1e9   : > { %v2245_v1 = vpop.eup %2244  ;;  %v1073_v40 = vadd.f32 1.0, %v2243_v32  ;;  %v1091_v41 = vmul.f32 %v1075_v31, %v1043_v5  ;;  %2248 = vtanh.f32 %v1046_v39  ;;  %v920_v51 = vpop.permute.xlu1 %919  ;;  %v1017_v5 = vmul.f32 %v913_v57, %v2776_v33 }
 0x1ea   : > { %v1074_v43 = vadd.f32 1.0, %v2245_v1  ;;  %v1092_v45 = vmul.f32 %v1076_v36, %v1044_v7  ;;  %2250 = vtanh.f32 %v1047_v42  ;;  %v1019_v59 = vmul.f32 %v920_v51, %v2776_v33 }
 0x1eb   : > { %v1089_v48 = vmul.f32 %v1073_v40, %v1041_v9  ;;  %2252 = vtanh.f32 %v1048_v46  ;;  %v1020_v61 = vmul.f32 %v920_v51, %v2770_v30  ;;  %v1003_v7 = vadd.f32 %v971_v55, %v2792_v44 }
 0x1ec   : > { %v1090_v50 = vmul.f32 %v1074_v43, %v1042_v10  ;;  %v1018_v9 = vmul.f32 %v913_v57, %v2770_v30  ;;  %v1004_v10 = vadd.f32 %v972_v58, %v2786_v38  ;;  %v1033_v17 = vadd.f32 %v1017_v5, %v1001_v63 }
 0x1ed   : > { %v1105_v52 = vpack.c.bf16 %v1091_v41, %v1089_v48  ;;  %v1035_v12 = vadd.f32 %v1019_v59, %v1003_v7  ;;  %v975_v43 = vperm.slane %v960_v35, 0  ;;  %v973_v48 = vperm.slane %v957_v37, 0 }
 0x1ee   : > { %v1106_v56 = vpack.c.bf16 %v1092_v45, %v1090_v50  ;;  %v2247_v62 = vpop.eup %2246  ;;  %v1036_v15 = vadd.f32 %v1020_v61, %v1004_v10  ;;  %v1034_v19 = vadd.f32 %v1018_v9, %v1002_v14  ;;  %v1049_v27 = vmul.f32 0.5, %v1033_v17 }
 0x1ef   : > { %1250 = vmatmul.bf16.vlgmr.msra.gmra.mxu3 %v1105_v52  ;;  %v2249_v8 = vpop.eup %2248  ;;  %v1077_v16 = vadd.f32 1.0, %v2247_v62  ;;  %v1051_v21 = vmul.f32 0.5, %v1035_v12  ;;  %v1007_v49 = vadd.f32 %v975_v43, %v2792_v44  ;;  %v1008_v52 = vadd.f32 %v976_v47, %v2786_v38 }
 0x1f0   : > { %1279 = vmatmul.bf16.vlgmr.msra.gmra.mxu2 %v1106_v56  ;;  %v2251_v11 = vpop.eup %2250  ;;  %v1078_v18 = vadd.f32 1.0, %v2249_v8  ;;  %v1052_v24 = vmul.f32 0.5, %v1036_v15  ;;  %v1050_v32 = vmul.f32 0.5, %v1034_v19  ;;  %v1005_v55 = vadd.f32 %v973_v48, %v2792_v44 }
 0x1f1   : > { %v2253_v13 = vpop.eup %2252  ;;  %v1079_v20 = vadd.f32 1.0, %v2251_v11  ;;  %v1093_v25 = vmul.f32 %v1077_v16, %v1045_v34  ;;  %2254 = vtanh.f32 %v1051_v21  ;;  %v934_v40 = vpop.permute.xlu1 %933  ;;  %v1006_v58 = vadd.f32 %v974_v29, %v2786_v38 }
 0x1f2   : > { %v1080_v23 = vadd.f32 1.0, %v2253_v13  ;;  %v1094_v31 = vmul.f32 %v1078_v18, %v1046_v39  ;;  %2256 = vtanh.f32 %v1052_v24  ;;  %v927_v34 = vpop.permute.xlu2 %926  ;;  %v1023_v26 = vmul.f32 %v934_v40, %v2776_v33 }
 0x1f3   : > { %v1095_v36 = vmul.f32 %v1079_v20, %v1047_v42  ;;  %2258 = vtanh.f32 %v1049_v27  ;;  %v1024_v39 = vmul.f32 %v934_v40, %v2770_v30  ;;  %v1022_v51 = vmul.f32 %v927_v34, %v2770_v30 }
 0x1f4   : > { %v1096_v1 = vmul.f32 %v1080_v23, %v1048_v46  ;;  %2260 = vtanh.f32 %v1050_v32  ;;  %v1021_v46 = vmul.f32 %v927_v34, %v2776_v33  ;;  %v1039_v56 = vadd.f32 %v1023_v26, %v1007_v49 }
 0x1f5   : > { %v1107_v41 = vpack.c.bf16 %v1095_v36, %v1093_v25  ;;  %v1040_v59 = vadd.f32 %v1024_v39, %v1008_v52  ;;  %v1038_v63 = vadd.f32 %v1022_v51, %v1006_v58 }
 0x1f6   : > { %v1108_v45 = vpack.c.bf16 %v1096_v1, %v1094_v31  ;;  %v1037_v61 = vadd.f32 %v1021_v46, %v1005_v55  ;;  %v1055_v5 = vmul.f32 0.5, %v1039_v56  ;;  %v2138_v31 = vld [vmem:[%s3076_s9] sm:$0xff] }
 0x1f7   : > { %v2255_v42 = vpop.eup %2254  ;;  %v1056_v8 = vmul.f32 0.5, %v1040_v59  ;;  %v1054_v11 = vmul.f32 0.5, %v1038_v63  ;;  %1365 = vmatpush.bf16.msrb.mxu0 %v2138_v31 }
 0x1f8   : > { %v2257_v50 = vpop.eup %2256  ;;  %v1083_v60 = vadd.f32 1.0, %v2255_v42  ;;  %v1053_v30 = vmul.f32 0.5, %v1037_v61  ;;  %2262 = vtanh.f32 %v1055_v5 }
 0x1f9   : > { %v2259_v54 = vpop.eup %2258  ;;  %v1084_v62 = vadd.f32 1.0, %v2257_v50  ;;  %2264 = vtanh.f32 %v1056_v8 }
 0x1fa   : > { %v2261_v57 = vpop.eup %2260  ;;  %v1081_v33 = vadd.f32 1.0, %v2259_v54  ;;  %v1099_v9 = vmul.f32 %v1083_v60, %v1051_v21  ;;  %2266 = vtanh.f32 %v1053_v30 }
 0x1fb   : > { %v1082_v7 = vadd.f32 1.0, %v2261_v57  ;;  %v1100_v10 = vmul.f32 %v1084_v62, %v1052_v24  ;;  %2268 = vtanh.f32 %v1054_v11 }
 0x1fc   : > { %v1097_v12 = vmul.f32 %v1081_v33, %v1049_v27 }
 0x1fd   : > { %v1098_v44 = vmul.f32 %v1082_v7, %v1050_v32  ;;  %v2841_v32 = vperm.slane %v2590_v0, 2 }
 0x1fe   : > { %v1109_v13 = vpack.c.bf16 %v1099_v9, %v1097_v12  ;;  %v2263_v14 = vpop.eup %2262 }
 0x1ff   : > { %1255 = vmatmul.bf16.gmra.mxu3 %v1107_v41  ;;  %v1110_v38 = vpack.c.bf16 %v1100_v10, %v1098_v44  ;;  %v2265_v15 = vpop.eup %2264  ;;  %v1087_v18 = vadd.f32 1.0, %v2263_v14 }
 0x200   : > { %1284 = vmatmul.bf16.gmra.mxu2 %v1108_v45  ;;  %v2267_v16 = vpop.eup %2266  ;;  %v1088_v19 = vadd.f32 1.0, %v2265_v15 }
 0x201   : > { %v2269_v17 = vpop.eup %2268  ;;  %v1085_v20 = vadd.f32 1.0, %v2267_v16  ;;  %v1103_v22 = vmul.f32 %v1087_v18, %v1055_v5 }
 0x202   : > { %v1086_v21 = vadd.f32 1.0, %v2269_v17  ;;  %v1104_v23 = vmul.f32 %v1088_v19, %v1056_v8 }
 0x203   : > { %v1101_v24 = vmul.f32 %v1085_v20, %v1053_v30 }
 0x204   : > { %v1102_v25 = vmul.f32 %v1086_v21, %v1054_v11 }
 0x205   : > { %v1111_v27 = vpack.c.bf16 %v1103_v22, %v1101_v24 }
 0x206   : > { %v1112_v28 = vpack.c.bf16 %v1104_v23, %v1102_v25 }
 0x20f   : > { %1260 = vmatmul.bf16.gmra.mxu3 %v1109_v13 }
 0x210   : > { %1289 = vmatmul.bf16.gmra.mxu2 %v1110_v38 }
 0x21f   : > { %1265 = vmatmul.bf16.gmra.mxu3 %v1111_v27 }
 0x220   : > { %1294 = vmatmul.bf16.gmra.mxu2 %v1112_v28 }
 0x272   : > { %v1251_v35 = vpop.f32.mrf.mxu3 }
 0x273   : > { %v1252_v36 = vadd.f32 %v1251_v35, %v2841_v32  ;;  %v1280_v1 = vpop.f32.mrf.mxu2 }
 0x275   : > { %v1281_v37 = vadd.f32 %v1280_v1, %v1252_v36 }
 0x277   : > { %v1300_v40 = vmul.f32 0.5, %v1281_v37 }
 0x279   : > { %2270 = vtanh.f32 %v1300_v40 }
 0x27a   : > { %v1253_v41 = vpop.f32.mrf.mxu3 }
 0x27b   : > { %v1254_v43 = vadd.f32 %v1253_v41, %v2841_v32  ;;  %v1282_v45 = vpop.f32.mrf.mxu2 }
 0x27d   : > { %v1283_v34 = vadd.f32 %v1282_v45, %v1254_v43 }
 0x27f   : > { %v1301_v47 = vmul.f32 0.5, %v1283_v34  ;;  %v2271_v26 = vpop.eup %2270 }
 0x280   : > { %v1316_v46 = vadd.f32 1.0, %v2271_v26 }
 0x281   : > { %2272 = vtanh.f32 %v1301_v47 }
 0x282   : > { %v1256_v48 = vpop.f32.mrf.mxu3  ;;  %v2846_v52 = vmul.f32 %v1316_v46, %v1300_v40 }
 0x283   : > { %v1257_v29 = vadd.f32 %v1256_v48, %v2841_v32  ;;  %v1285_v39 = vpop.f32.mrf.mxu2  ;;  %v2880_v48 = vperm.slane %v2590_v0, 3 }
 0x285   : > { %v1286_v42 = vadd.f32 %v1285_v39, %v1257_v29 }
 0x287   : > { %v2273_v49 = vpop.eup %2272  ;;  %v1302_v51 = vmul.f32 0.5, %v1286_v42 }
 0x288   : > { %v1317_v50 = vadd.f32 1.0, %v2273_v49 }
 0x289   : > { %2274 = vtanh.f32 %v1302_v51 }
 0x28a   : > { %v2848_v54 = vmul.f32 %v1317_v50, %v1301_v47  ;;  %v1258_v55 = vpop.f32.mrf.mxu3 }
 0x28b   : > { %v1259_v56 = vadd.f32 %v1258_v55, %v2841_v32  ;;  %v1287_v57 = vpop.f32.mrf.mxu2  ;;  %v2885_v55 = vperm.slane %v2590_v0, 4 }
 0x28c   : > { %v1332_v58 = vpack.c.bf16 %v2848_v54, %v2846_v52 }
 0x28d   : > { %v1288_v59 = vadd.f32 %v1287_v57, %v1259_v56 }
 0x28e   : > { %2100 = vmatmul.msk.bf16.vlgmr.msrb.gmra.mxu0 %vm1345_vm13, %v1332_v58 }
 0x28f   : > { %v1303_v60 = vmul.f32 0.5, %v1288_v59  ;;  %v2275_v62 = vpop.eup %2274 }
 0x290   : > { %v1318_v7 = vadd.f32 1.0, %v2275_v62 }
 0x291   : > { %2276 = vtanh.f32 %v1303_v60 }
 0x292   : > { %v1261_v61 = vpop.f32.mrf.mxu3  ;;  %v2855_v10 = vmul.f32 %v1318_v7, %v1302_v51 }
 0x293   : > { %v1262_v63 = vadd.f32 %v1261_v61, %v2841_v32  ;;  %v1290_v33 = vpop.f32.mrf.mxu2 }
 0x295   : > { %v1291_v5 = vadd.f32 %v1290_v33, %v1262_v63 }
 0x297   : > { %v2277_v8 = vpop.eup %2276  ;;  %v1304_v30 = vmul.f32 0.5, %v1291_v5 }
 0x298   : > { %v1319_v9 = vadd.f32 1.0, %v2277_v8 }
 0x299   : > { %2278 = vtanh.f32 %v1304_v30 }
 0x29a   : > { %v2857_v11 = vmul.f32 %v1319_v9, %v1303_v60  ;;  %v1263_v12 = vpop.f32.mrf.mxu3 }
 0x29b   : > { %v1264_v44 = vadd.f32 %v1263_v12, %v2841_v32  ;;  %v1292_v13 = vpop.f32.mrf.mxu2 }
 0x29c   : > { %v1333_v38 = vpack.c.bf16 %v2857_v11, %v2855_v10 }
 0x29d   : > { %v1293_v14 = vadd.f32 %v1292_v13, %v1264_v44 }
 0x29e   : > { %2101 = vmatmul.msk.bf16.gmra.mxu0 %vm1345_vm13, %v1333_v38 }
 0x29f   : > { %v1305_v15 = vmul.f32 0.5, %v1293_v14  ;;  %v2279_v17 = vpop.eup %2278 }
 0x2a0   : > { %v1320_v21 = vadd.f32 1.0, %v2279_v17 }
 0x2a1   : > { %2280 = vtanh.f32 %v1305_v15 }
 0x2a2   : > { %v1266_v16 = vpop.f32.mrf.mxu3  ;;  %v2864_v25 = vmul.f32 %v1320_v21, %v1304_v30 }
 0x2a3   : > { %v1267_v18 = vadd.f32 %v1266_v16, %v2841_v32  ;;  %v1295_v19 = vpop.f32.mrf.mxu2 }
 0x2a5   : > { %v1296_v20 = vadd.f32 %v1295_v19, %v1267_v18 }
 0x2a7   : > { %v2281_v22 = vpop.eup %2280  ;;  %v1306_v24 = vmul.f32 0.5, %v1296_v20 }
 0x2a8   : > { %v1321_v23 = vadd.f32 1.0, %v2281_v22 }
 0x2a9   : > { %2282 = vtanh.f32 %v1306_v24 }
 0x2aa   : > { %v2866_v27 = vmul.f32 %v1321_v23, %v1305_v15  ;;  %v1268_v28 = vpop.f32.mrf.mxu3 }
 0x2ab   : > { %v1269_v31 = vadd.f32 %v1268_v28, %v2841_v32  ;;  %v1297_v35 = vpop.f32.mrf.mxu2 }
 0x2ac   : > { %v1334_v36 = vpack.c.bf16 %v2866_v27, %v2864_v25 }
 0x2ad   : > { %v1298_v1 = vadd.f32 %v1297_v35, %v1269_v31  ;;  %v1454_v35 = vrot.slane %v2590_v0, 5 }
 0x2ae   : > { %2102 = vmatmul.msk.bf16.gmra.mxu0 %vm1345_vm13, %v1334_v36 }
 0x2af   : > { %v1307_v37 = vmul.f32 0.5, %v1298_v1  ;;  %v2283_v40 = vpop.eup %2282  ;;  %v2418_v1 = vmov 0   ;;  %2140 = vpush %v1454_v35 }
 0x2b0   : > { %v1322_v41 = vadd.f32 1.0, %v2283_v40  ;;  %2236 = vset.pattern.permute.xlu2 %v2418_v1  ;;  %2237 = vset.pattern.permute.xlu0 %v2418_v1 }
 0x2b1   : > { %2284 = vtanh.f32 %v1307_v37 }
 0x2b2   : > { %v2872_v34 = vmul.f32 %v1322_v41, %v1306_v24 }
 0x2b7   : > { %v2285_v43 = vpop.eup %2284 }
 0x2b8   : > { %v1323_v45 = vadd.f32 1.0, %v2285_v43 }
 0x2ba   : > { %v2874_v47 = vmul.f32 %v1323_v45, %v1307_v37 }
 0x2bc   : > { %v1335_v32 = vpack.c.bf16 %v2874_v47, %v2872_v34 }
 0x2be   : > { %2103 = vmatmul.msk.bf16.gmra.mxu0 %vm1345_vm13, %v1335_v32 }
 0x2e0   : > { %s2141_s29 = spop %2140 }
 0x30b   : > { %v1367_v26 = vpop.f32.mrf.mxu0 }
 0x30c   : > { %v1368_v29 = vadd.f32 %v1367_v26, %v2880_v48 }
 0x30e   : > { %v1387_v39 = vmul.f32 0.5, %v1368_v29 }
 0x310   : > { %2286 = vtanh.f32 %v1387_v39 }
 0x313   : > { %v1369_v42 = vpop.f32.mrf.mxu0 }
 0x314   : > { %v1370_v46 = vadd.f32 %v1369_v42, %v2880_v48 }
 0x316   : > { %v2287_v49 = vpop.eup %2286  ;;  %v1388_v50 = vmul.f32 0.5, %v1370_v46 }
 0x317   : > { %v1403_v51 = vadd.f32 1.0, %v2287_v49 }
 0x318   : > { %2288 = vtanh.f32 %v1388_v50 }
 0x319   : > { %v1411_v56 = vmul.f32 %v1403_v51, %v1387_v39 }
 0x31b   : > { %v1372_v57 = vpop.f32.mrf.mxu0  ;;  %v1420_v58 = vmul.f32 %v2885_v55, %v1411_v56 }
 0x31c   : > { %v1373_v59 = vadd.f32 %v1372_v57, %v2880_v48 }
 0x31d   : > { %v1429_v60 = vsel %vm1428_vm14, %v1420_v58, 0.0 }
 0x31e   : > { %v2289_v61 = vpop.eup %2288  ;;  %v1389_v62 = vmul.f32 0.5, %v1373_v59  ;;  %1430 = vadd.xlane.f32.xlu2 %v1429_v60 }
 0x31f   : > { %v1404_v63 = vadd.f32 1.0, %v2289_v61 }
 0x320   : > { %2290 = vtanh.f32 %v1389_v62 }
 0x321   : > { %v1412_v33 = vmul.f32 %v1404_v63, %v1388_v50 }
 0x323   : > { %v1374_v5 = vpop.f32.mrf.mxu0  ;;  %v1421_v7 = vmul.f32 %v2885_v55, %v1412_v33 }
 0x324   : > { %v1375_v8 = vadd.f32 %v1374_v5, %v2880_v48 }
 0x325   : > { %v1432_v9 = vsel %vm1428_vm14, %v1421_v7, 0.0 }
 0x326   : > { %v2291_v30 = vpop.eup %2290  ;;  %v1390_v12 = vmul.f32 0.5, %v1375_v8  ;;  %1433 = vadd.xlane.f32.xlu1 %v1432_v9 }
 0x327   : > { %v1405_v44 = vadd.f32 1.0, %v2291_v30 }
 0x328   : > { %2292 = vtanh.f32 %v1390_v12 }
 0x329   : > { %v1413_v13 = vmul.f32 %v1405_v44, %v1389_v62 }
 0x32b   : > { %v1377_v38 = vpop.f32.mrf.mxu0  ;;  %v1422_v14 = vmul.f32 %v2885_v55, %v1413_v13 }
 0x32c   : > { %v1378_v15 = vadd.f32 %v1377_v38, %v2880_v48 }
 0x32d   : > { %v1435_v16 = vsel %vm1428_vm14, %v1422_v14, 0.0  ;;  %v1481_v14 = vand.u32 127, %v880_v53 }
 0x32e   : > { %v2293_v17 = vpop.eup %2292  ;;  %v1391_v18 = vmul.f32 0.5, %v1378_v15  ;;  %1436 = vadd.xlane.f32.xlu0 %v1435_v16 }
 0x32f   : > { %v1406_v19 = vadd.f32 1.0, %v2293_v17 }
 0x330   : > { %2294 = vtanh.f32 %v1391_v18 }
 0x331   : > { %v1414_v20 = vmul.f32 %v1406_v19, %v1390_v12  ;;  %v1456_v12 = vstv %s2141_s29 }
 0x333   : > { %v1379_v21 = vpop.f32.mrf.mxu0  ;;  %v1423_v22 = vmul.f32 %v2885_v55, %v1414_v20 }
 0x334   : > { %v1380_v23 = vadd.f32 %v1379_v21, %v2880_v48 }
 0x335   : > { %v1438_v24 = vsel %vm1428_vm14, %v1423_v22, 0.0 }
 0x336   : > { %v2295_v28 = vpop.eup %2294  ;;  %v1392_v31 = vmul.f32 0.5, %v1380_v23  ;;  %1439 = vadd.xlane.f32.xlu2 %v1438_v24 }
 0x337   : > { %v1407_v36 = vadd.f32 1.0, %v2295_v28 }
 0x338   : > { %2296 = vtanh.f32 %v1392_v31 }
 0x339   : > { %v1415_v37 = vmul.f32 %v1407_v36, %v1391_v18 }
 0x33b   : > { %v1382_v40 = vpop.f32.mrf.mxu0  ;;  %v1424_v41 = vmul.f32 %v2885_v55, %v1415_v37 }
 0x33c   : > { %v1383_v43 = vadd.f32 %v1382_v40, %v2880_v48 }
 0x33d   : > { %v1441_v45 = vsel %vm1428_vm14, %v1424_v41, 0.0 }
 0x33e   : > { %v2297_v32 = vpop.eup %2296  ;;  %v1393_v26 = vmul.f32 0.5, %v1383_v43  ;;  %1442 = vadd.xlane.f32.xlu2 %v1441_v45 }
 0x33f   : > { %v1408_v29 = vadd.f32 1.0, %v2297_v32 }
 0x340   : > { %2298 = vtanh.f32 %v1393_v26 }
 0x341   : > { %v1416_v39 = vmul.f32 %v1408_v29, %v1392_v31 }
 0x343   : > { %v1384_v42 = vpop.f32.mrf.mxu0  ;;  %v1425_v46 = vmul.f32 %v2885_v55, %v1416_v39 }
 0x344   : > { %v1385_v49 = vadd.f32 %v1384_v42, %v2880_v48 }
 0x345   : > { %v1444_v50 = vsel %vm1428_vm14, %v1425_v46, 0.0 }
 0x346   : > { %v2299_v51 = vpop.eup %2298  ;;  %v1394_v56 = vmul.f32 0.5, %v1385_v49  ;;  %1445 = vadd.xlane.f32.xlu1 %v1444_v50 }
 0x347   : > { %v1409_v57 = vadd.f32 1.0, %v2299_v51 }
 0x348   : > { %2300 = vtanh.f32 %v1394_v56 }
 0x349   : > { %v1417_v58 = vmul.f32 %v1409_v57, %v1393_v26 }
 0x34b   : > { %v1426_v59 = vmul.f32 %v2885_v55, %v1417_v58 }
 0x34d   : > { %v1447_v60 = vsel %vm1428_vm14, %v1426_v59, 0.0 }
 0x34e   : > { %v2301_v61 = vpop.eup %2300  ;;  %1448 = vadd.xlane.f32.xlu2 %v1447_v60 }
 0x34f   : > { %v1410_v62 = vadd.f32 1.0, %v2301_v61 }
 0x351   : > { %v1418_v63 = vmul.f32 %v1410_v62, %v1394_v56 }
 0x353   : > { %v1427_v33 = vmul.f32 %v2885_v55, %v1418_v63 }
 0x355   : > { %v1450_v48 = vsel %vm1428_vm14, %v1427_v33, 0.0 }
 0x356   : > { %1451 = vadd.xlane.f32.xlu1 %v1450_v48 }
 0x366   : > { %1468 = vperm.xlu2 %2236, %v2641_v6  }
 0x391   : > { %v1431_v5 = vpop.xlane.xlu2 %1430 }
 0x392   : > { %v1458_v15 = vadd.f32 %v1456_v12, %v1431_v5 }
 0x394   : > { %v1482_v21 = vperm.slane %v1458_v15, %v1481_v14 }
 0x399   : > { %v1434_v8 = vpop.xlane.xlu1 %1433 }
 0x39a   : > { %v1459_v44 = vadd.f32 %v1456_v12, %v1434_v8 }
 0x39c   : > { %v1483_v17 = vperm.slane %v1459_v44, %v1481_v14 }
 0x39e   : > { %v1490_v28 = vsel %vm940_vm5, %v1483_v17, %v1482_v21 }
 0x3a1   : > { %v1437_v30 = vpop.xlane.xlu0 %1436 }
 0x3a2   : > { %v1460_v13 = vadd.f32 %v1456_v12, %v1437_v30 }
 0x3a4   : > { %v1484_v19 = vperm.slane %v1460_v13, %v1481_v14 }
 0x3a6   : > { %v1491_v35 = vsel %vm943_vm8, %v1484_v19, %v1490_v28 }
 0x3a9   : > { %v1440_v7 = vpop.xlane.xlu2 %1439 }
 0x3aa   : > { %v1461_v16 = vadd.f32 %v1456_v12, %v1440_v7 }
 0x3ac   : > { %v1485_v22 = vperm.slane %v1461_v16, %v1481_v14 }
 0x3ae   : > { %v1492_v1 = vsel %vm946_vm7, %v1485_v22, %v1491_v35 }
 0x3b1   : > { %v1443_v9 = vpop.xlane.xlu2 %1442 }
 0x3b2   : > { %v1462_v55 = vadd.f32 %v1456_v12, %v1443_v9 }
 0x3b4   : > { %v1486_v24 = vperm.slane %v1462_v55, %v1481_v14 }
 0x3b6   : > { %v1493_v53 = vsel %vm949_vm10, %v1486_v24, %v1492_v1 }
 0x3b9   : > { %v1446_v38 = vpop.xlane.xlu1 %1445 }
 0x3ba   : > { %v1463_v18 = vadd.f32 %v1456_v12, %v1446_v38 }
 0x3bc   : > { %v1487_v31 = vperm.slane %v1463_v18, %v1481_v14 }
 0x3be   : > { %v1494_v37 = vsel %vm952_vm9, %v1487_v31, %v1493_v53 }
 0x3c1   : > { %v1449_v20 = vpop.xlane.xlu2 %1448 }
 0x3c2   : > { %v1464_v23 = vadd.f32 %v1456_v12, %v1449_v20 }
 0x3c4   : > { %v1488_v36 = vperm.slane %v1464_v23, %v1481_v14 }
 0x3c6   : > { %v1495_v40 = vsel %vm955_vm12, %v1488_v36, %v1494_v37 }
 0x3c9   : > { %v1452_v41 = vpop.xlane.xlu1 %1451  ;;  %v1469_v43 = vpop.permute.xlu2 %1468 }
 0x3ca   : > { %v1465_v45 = vadd.f32 %v1456_v12, %v1452_v41  ;;  %v1550_v32 = vmul.f32 %v1469_v43, %v2846_v52  ;;  %v1551_v26 = vmul.f32 %v1469_v43, %v2848_v54  ;;  %v1552_v29 = vmul.f32 %v1469_v43, %v2855_v10 }
 0x3cb   : > { %v1553_v39 = vmul.f32 %v1469_v43, %v2857_v11  ;;  %v1554_v42 = vmul.f32 %v1469_v43, %v2864_v25  ;;  %v1555_v46 = vmul.f32 %v1469_v43, %v2866_v27  ;;  %v1556_v49 = vmul.f32 %v1469_v43, %v2872_v34 }
 0x3cc   : > { %v1489_v50 = vperm.slane %v1465_v45, %v1481_v14  ;;  %v1557_v51 = vmul.f32 %v1469_v43, %v2874_v47  ;;  %v1559_v56 = vsel %vm1345_vm13, %v1550_v32, 0.0  ;;  %v1566_v57 = vsel %vm1345_vm13, %v1551_v26, 0.0 }
 0x3cd   : > { %v1560_v52 = vrot.slane %v1559_v56, 4  ;;  %v1567_v58 = vrot.slane %v1566_v57, 4  ;;  %v1573_v54 = vsel %vm1345_vm13, %v1552_v29, 0.0  ;;  %v1580_v10 = vsel %vm1345_vm13, %v1553_v39, 0.0 }
 0x3ce   : > { %v1574_v11 = vrot.slane %v1573_v54, 4  ;;  %v1581_v59 = vrot.slane %v1580_v10, 4  ;;  %v1587_v25 = vsel %vm1345_vm13, %v1554_v42, 0.0  ;;  %v1594_v27 = vsel %vm1345_vm13, %v1555_v46, 0.0 }
 0x3cf   : > { %v1561_v34 = vadd.f32 %v1560_v52, %v1559_v56  ;;  %v1568_v60 = vadd.f32 %v1567_v58, %v1566_v57  ;;  %v1588_v61 = vrot.slane %v1587_v25, 4  ;;  %v1595_v47 = vrot.slane %v1594_v27, 4  ;;  %v1558_v52 = vld [vmem:[#allocation3] sm:$0xff] }
 0x3d0   : > { %v1575_v62 = vadd.f32 %v1574_v11, %v1573_v54  ;;  %v1582_v63 = vadd.f32 %v1581_v59, %v1580_v10  ;;  %v1601_v33 = vsel %vm1345_vm13, %v1556_v49, 0.0  ;;  %v1471_v48 = vmul.f32 %v1469_v43, %v2628_v3 }
 0x3d1   : > { %v1562_v5 = vrot.slane %v1561_v34, 2  ;;  %v1569_v7 = vrot.slane %v1568_v60, 2  ;;  %v1589_v8 = vadd.f32 %v1588_v61, %v1587_v25  ;;  %v1596_v9 = vadd.f32 %v1595_v47, %v1594_v27 }
 0x3d2   : > { %v1576_v30 = vrot.slane %v1575_v62, 2  ;;  %v1583_v12 = vrot.slane %v1582_v63, 2  ;;  %v1602_v44 = vrot.slane %v1601_v33, 4  ;;  %1515 = vmatpush.msra.mxu1 %v1471_v48  ;;  %v1497_v13 = vsel %vm1496_vm15, %v1489_v50, %v1495_v40 }
 0x3d3   : > { %v1563_v38 = vadd.f32 %v1562_v5, %v1561_v34  ;;  %v1570_v14 = vadd.f32 %v1569_v7, %v1568_v60  ;;  %v1590_v15 = vrot.slane %v1589_v8, 2  ;;  %2104 = vmatmul.msk.f32.vlgmr.msra.gmra.mxu1 %vm789_vm3, %v1497_v13  ;;  %v1597_v16 = vrot.slane %v1596_v9, 2  ;;  %v1540_v34 = vld [vmem:[#allocation2] sm:$0xff] }
 0x3d4   : > { %v1577_v55 = vadd.f32 %v1576_v30, %v1575_v62  ;;  %v1584_v17 = vadd.f32 %v1583_v12, %v1582_v63  ;;  %v1603_v18 = vadd.f32 %v1602_v44, %v1601_v33  ;;  %v1608_v3 = vsel %vm1345_vm13, %v1557_v51, 0.0  ;;  %1535 = vmatpush.msrb.mxu1 %v2641_v6 }
 0x3d5   : > { %v1564_v19 = vrot.slane %v1563_v38, 1  ;;  %v1571_v20 = vrot.slane %v1570_v14, 1  ;;  %v1591_v21 = vadd.f32 %v1590_v15, %v1589_v8  ;;  %v1598_v22 = vadd.f32 %v1597_v16, %v1596_v9 }
 0x3d6   : > { %v1578_v23 = vrot.slane %v1577_v55, 1  ;;  %v1585_v24 = vrot.slane %v1584_v17, 1  ;;  %v1604_v28 = vrot.slane %v1603_v18, 2  ;;  %v1609_v31 = vrot.slane %v1608_v3, 4 }
 0x3d7   : > { %v1565_v35 = vadd.f32 %v1564_v19, %v1563_v38  ;;  %v1572_v36 = vadd.f32 %v1571_v20, %v1570_v14  ;;  %v1592_v1 = vrot.slane %v1591_v21, 1  ;;  %v1599_v53 = vrot.slane %v1598_v22, 1 }
 0x3d8   : > { %v1579_v37 = vadd.f32 %v1578_v23, %v1577_v55  ;;  %v1605_v40 = vadd.f32 %v1604_v28, %v1603_v18  ;;  %v1610_v41 = vadd.f32 %v1609_v31, %v1608_v3  ;;  %v1586_v43 = vadd.f32 %v1585_v24, %v1584_v17 }
 0x3d9   : > { %v1623_v45 = vsel %vm940_vm5, %v1572_v36, %v1565_v35  ;;  %v1593_v32 = vadd.f32 %v1592_v1, %v1591_v21  ;;  %v1600_v39 = vadd.f32 %v1599_v53, %v1598_v22 }
 0x3da   : > { %v1606_v6 = vrot.slane %v1605_v40, 1  ;;  %v1611_v26 = vrot.slane %v1610_v41, 2  ;;  %v1624_v29 = vsel %vm943_vm8, %v1579_v37, %v1623_v45 }
 0x3db   : > { %v1625_v42 = vsel %vm946_vm7, %v1586_v43, %v1624_v29  ;;  %2105 = vmatmul.msk.f32.vlgmr.msrb.gmra.mxu1 %vm789_vm3, %v1497_v13 }
 0x3dc   : > { %v1612_v46 = vadd.f32 %v1611_v26, %v1610_v41  ;;  %v1626_v49 = vsel %vm949_vm10, %v1593_v32, %v1625_v42  ;;  %v1607_v50 = vadd.f32 %v1606_v6, %v1605_v40 }
 0x3dd   : > { %v1627_v51 = vsel %vm952_vm9, %v1600_v39, %v1626_v49 }
 0x3de   : > { %v1613_v56 = vrot.slane %v1612_v46, 1  ;;  %v1628_v57 = vsel %vm955_vm12, %v1607_v50, %v1627_v51 }
 0x3e0   : > { %v1614_v58 = vadd.f32 %v1613_v56, %v1612_v46 }
 0x3e2   : > { %v1629_v54 = vsel %vm1496_vm15, %v1614_v58, %v1628_v57 }
 0x3e3   : > { %v1631_v10 = vadd.f32 %v1629_v54, %v1558_v52 }
 0x3e5   : > { %1632 = vst.msk [vmem:[#allocation3] sm:$0xff] %vm1345_vm13, %v1631_v10 }
 0x450   : > { %v1517_v11 = vpop.f32.mrf.mxu1 }
 0x458   : > { %v1537_v59 = vpop.f32.mrf.mxu1 }
 0x459   : > { %1543 = vperm.xlu0 %2237, %v1537_v59  }
 0x4cb   : > { %v1544_v25 = vpop.permute.xlu0 %1543 }
 0x4cc   : > { %v1546_v27 = vmul.f32 %v1544_v25, %v2619_v2 }
 0x4ce   : > { %v1547_v60 = vsub.f32 %v1546_v27, %v1517_v11  ;;  %1636 = sbr.rel (%p2106_p3) target bundleno = 1634 (0x662), region = 84 }
 0x4d0   : > { %v1548_v61 = vadd.f32 %v1547_v60, %v1540_v34 }
 0x4d2   : > { %1549 = vst.msk [vmem:[#allocation2] sm:$0xff] %vm789_vm3, %v1548_v61 }
 0x4d3   : > { %v1637_v47 = vld [vmem:[%s684_s25] sm:$0xff]  ;;  %v1652_v62 = vld [vmem:[%s3077_s10 + $0x18] sm:$0xff]  ;;  %v1651_v63 = vld [vmem:[%s3077_s10 + $0x10] sm:$0xff]  ;;  %v2419_v33 = vmov 0   ;;  %v1701_v20 = vperm.slane %v2590_v0, 6  ;;  %v1715_v36 = vperm.slane %v2590_v0, 7 }
 0x4d4   : > { %2302 = vset.pattern.permute.xlu0 %v2419_v33  ;;  %1693 = vmatpush.msra.mxu1 %v1652_v62  ;;  %v1654_v48 = vld [vmem:[%s3128_s19 + $0x8] sm:$0xff]  ;;  %v1653_v7 = vld [vmem:[%s3129_s28] sm:$0xff]  ;;  %v1714_v14 = vld [vmem:[%s3130_s26 + $0x38] sm:$0xff] }
 0x4d5   : > { %1641 = vperm.xlu0 %2302, %v1637_v47   ;;  %1672 = vmatpush.msra.mxu0 %v1654_v48  ;;  %v1650_v5 = vld [vmem:[%s3077_s10 + $0x8] sm:$0xff]  ;;  %v1649_v8 = vld [vmem:[%s3077_s10] sm:$0xff]  ;;  %v1713_v15 = vld [vmem:[%s3131_s13 + $0x30] sm:$0xff] }
 0x4d6   : > { %1694 = vmatpush.msra.mxu1 %v1651_v63  ;;  %v1647_v30 = vld [vmem:[#allocation3] sm:$0xff]  ;;  %1727 = vmatpush.msra.mxu2 %v1714_v14  ;;  %v1711_v16 = vld [vmem:[%s3131_s13 + $0x20] sm:$0xff]  ;;  %v1710_v55 = vld [vmem:[%s3131_s13 + $0x18] sm:$0xff] }
 0x4d7   : > { %1673 = vmatpush.msra.mxu0 %v1653_v7  ;;  %v1709_v17 = vld [vmem:[%s3131_s13 + $0x10] sm:$0xff]  ;;  %v1708_v18 = vld [vmem:[%s3131_s13 + $0x8] sm:$0xff]  ;;  %v1707_v3 = vld [vmem:[%s3131_s13] sm:$0xff] }
 0x4d8   : > { %1695 = vmatpush.msra.mxu1 %v1650_v5  ;;  %1728 = vmatpush.msra.mxu2 %v1713_v15 }
 0x4d9   : > { %v1638_v9 = vld [vmem:[#allocation2] sm:$0xff] }
 0x4da   : > { %1696 = vmatpush.msra.mxu1 %v1649_v8 }
 0x4db   : > { %2108 = vmatmul.msk.f32.vlgmr.msra.gmra.mxu1 %vm822_vm4, %v2630_v4 }
 0x547   : > { %v1642_v12 = vpop.permute.xlu0 %1641 }
 0x548   : > { %v1644_v44 = vmul.f32 %v1642_v12, %v1638_v9  ;;  %v1648_v13 = vmul.f32 %v1647_v30, %v1642_v12 }
 0x54a   : > { %v1645_v38 = vadd.f32 %v1644_v44, %v2619_v2  ;;  %2107 = vmatmul.msk.f32.vlgmr.msra.gmra.mxu0 %vm1345_vm13, %v1648_v13  ;;  %v1712_v2 = vld [vmem:[%s3131_s13 + $0x28] sm:$0xff] }
 0x54b   : > { %1729 = vmatpush.msra.mxu2 %v1712_v2 }
 0x54c   : > { %1646 = vst.msk [vmem:[%s700_s30] sm:$0xff] %vm789_vm3, %v1645_v38 }
 0x54d   : > { %1730 = vmatpush.msra.mxu2 %v1711_v16 }
 0x54f   : > { %1731 = vmatpush.msra.mxu2 %v1710_v55 }
 0x551   : > { %1732 = vmatpush.msra.mxu2 %v1709_v17 }
 0x553   : > { %1733 = vmatpush.msra.mxu2 %v1708_v18 }
 0x555   : > { %1734 = vmatpush.msra.mxu2 %v1707_v3 }
 0x558   : > { %v1698_v19 = vpop.f32.mrf.mxu1 }
 0x5c7   : > { %v1675_v21 = vpop.f32.mrf.mxu0 }
 0x5c8   : > { %v1699_v22 = vadd.f32 %v1698_v19, %v1675_v21 }
 0x5ca   : > { %v1702_v23 = vadd.f32 %v1701_v20, %v1699_v22 }
 0x5cc   : > { %v1703_v24 = vmul.f32 0.5, %v1702_v23 }
 0x5ce   : > { %2303 = vtanh.f32 %v1703_v24 }
 0x5d4   : > { %v2304_v28 = vpop.eup %2303 }
 0x5d5   : > { %v1705_v31 = vadd.f32 1.0, %v2304_v28 }
 0x5d7   : > { %v1706_v35 = vmul.f32 %v1705_v31, %v1703_v24 }
 0x5d9   : > { %2109 = vmatmul.msk.f32.vlgmr.msra.gmra.mxu2 %vm1428_vm14, %v1706_v35 }
 0x65c   : > { %v1736_v1 = vpop.f32.mrf.mxu2 }
 0x65d   : > { %v1737_v53 = vadd.f32 %v1736_v1, %v1715_v36 }
 0x65f   : > { %v1739_v37 = vadd.f32 %v1737_v53, %v2630_v4 }
 0x661   : > { %1740 = vst.msk [vmem:[%s644_s12] sm:$0xff] %vm822_vm4, %v1739_v37 }
 0x662 PF: > { %s3132_s26 = sld [smem:[#allocation12_spill]]  ;;  %s1767_s25 = sshll.u32 %s644_s12, 4  ;;  %s1768_s25 = int_to_ptr.vmem [resolvable:$true] %s1767_s25 }
 0x663   : > { %s3133_s21 = sld [smem:[#allocation11_spill]] }
 0x664   : > { %s3134_s19 = sld [smem:[#allocation9_spill]] }
 0x665   : > { %s3136_s17 = sld [smem:[#allocation28_spill]] }
 0x668   : > { %s2142_s23 = smul.u32 3, %s3132_s26 }
 0x66a   : > { %s1763_s22 = sadd.s32 %s3133_s21, %s2142_s23  ;;  %s3137_s15 = sand.u32 1, %s3134_s19  }
 0x66b   : > { %s2111_s27 = sshll.u32 %s1763_s22, 3  ;;  %s1750_s11 = scalar_lea.sflag [#allocation6], %s3137_s15 }
 0x66c   : > { %s1765_s20 = scalar_lea.hbm %s3136_s17, %s2111_s27  ;;  %s2325_s26 = scalar_lea.hbm %s3136_s17, 48 }
 0x66d   : > { %s1769_s16 = sshll.u32 %s1765_s20, 4  ;;  %s1770_s16 = int_to_ptr.hbm [resolvable:$true] %s1769_s16 }
 0x66e   : > { %s2319_s0 = sshra.s32 %s1770_s16, 4  ;;  %s2320_s0 = int_to_ptr.hbm [resolvable:$true] %s2319_s0 }
 0x66f   : > { %s2321_s1 = scalar_lea.hbm %s2320_s0, 8  ;;  %p2326_p9 = scmp.lt.s32.totalorder %s2320_s0, %s3136_s17 }
 0x670   : > { %p2322_p4 = scmp.ne.s32.totalorder %s2320_s0, %s2321_s1  ;;  %p2327_p10 = scmp.lt.s32.totalorder %s2325_s26, %s2321_s1 }
 0x672   : > { %p2323_p5 = pnand %p2322_p4, %p2562_p6  ;;  %p2328_p11 = por %p2327_p10, %p2326_p9 }
 0x674   : > { %p2324_p8 = pneg %p2323_p5 }
 0x676   : > { %p2329_p12 = pnand %p2328_p11, %p2324_p8 }
 0x678   : > { %2332 = shalt.err (!%p2329_p12)
}
 0x679   : > { %2143 = dma.vmem_to_hbm [thread:$0]  (%p2562_p6), %s1768_s25, 128, %s1770_s16, %s1750_s11  }
 0x67a PF: > { %s3138_s19 = sld [smem:[#allocation16_spill]] }
 0x67b   : > { %s3139_s22 = sld [smem:[#allocation8_spill]] }
 0x680   : > { %p2149_p13 = scmp.ge.s32.totalorder %s3138_s19, 2 }
 0x681   : > { %s1792_s30 = sand.u32 1, %s3139_s22  }
 0x682   : > { %p2146_p0 = pnand %p2149_p13, %p2569_p7  ;;  %s1793_s29 = scalar_lea.sflag [#allocation6], %s1792_s30 }
 0x684   : > { %p2147_p1 = pneg %p2146_p0 }
 0x686   : > { %2374 = dma.done.wait (%p2147_p1), %s1793_s29, 128  }
 0x687   : > { %2376 = vsyncadd (%p2147_p1), %s1793_s29, 4294967168  ;;  %s29_s27 = sadd.s32 1, %s3138_s19   ;;  %s3141_s18 = sld [smem:[#allocation9_spill]] }
 0x688   : > { %p26_p2 = scmp.ge.s32.totalorder %s29_s27, 20   ;;  %s3142_s19 = sld [smem:[#allocation10_spill]] }
 0x689   : > { %s3143_s20 = sld [smem:[#allocation22_spill]] }
 0x68a   : > { %s3144_s21 = sld [smem:[#allocation13_spill]] }
 0x68b   : > { %s3145_s22 = sld [smem:[#allocation14_spill]]  ;;  %28 = sbr.rel (!%p26_p2) target bundleno = 13 (0xd), region = 146 }
 0x68c   : > { %s3146_s23 = sld [smem:[#allocation15_spill]] }
 0x68d   : > { %s3147_s24 = sld [smem:[#allocation17_spill]] }
 0x68e   : > { %s3148_s25 = sld [smem:[#allocation19_spill]] }
 0x68f   : > { %s3149_s26 = sld [smem:[#allocation21_spill]] }
 0x690   :  { %1799 = vsyncpa [#allocation6], 1 }
 0x691   :  { %1801 = vsyncpa [#allocation6 + $0x1], 1 }

</bundles_post_ra>
